<compile_context>
chip_gen: v5e
topology: v5e:2x2
jax: 0.10.0
libtpu: 0.0.40
codegen_flags: <defaults>
</compile_context>

<pallas_src>
import math
from functools import partial

import jax
import jax.numpy as jnp
from jax import lax
from jax.experimental import pallas as pl
from jax.experimental.pallas import tpu as pltpu

EPS = 1e-5  # fairseq LayerNorm eps


# ----------------------------- small math helpers -----------------------------
def _layer_norm(x, g, b):
    mu = jnp.mean(x, axis=-1, keepdims=True)
    xc = x - mu
    var = jnp.mean(xc * xc, axis=-1, keepdims=True)
    return xc * lax.rsqrt(var + EPS) * g + b


def sinusoidal_positions(T, C, padding_idx=0):
    """fairseq SinusoidalPositionalEmbedding rows for positions padding_idx+1 .. padding_idx+T.
    (Assumes no padding tokens in prev_output_tokens, so make_positions() gives 1..T.)"""
    half = C // 2
    scale = math.log(10000.0) / (half - 1)
    inv = jnp.exp(jnp.arange(half, dtype=jnp.float32) * -scale)
    pos = jnp.arange(padding_idx + 1, padding_idx + 1 + T, dtype=jnp.float32)
    ang = pos[:, None] * inv[None, :]
    return jnp.concatenate([jnp.sin(ang), jnp.cos(ang)], axis=1).astype(jnp.float32)  # (T, C)


# --------------------------------- Pallas kernel ---------------------------------
def decoder_kernel(x_ref, pos_ref,
                   wqkv_ref, bqkv_ref, wo_ref, bo_ref,
                   w1_ref, b1_ref, w2_ref, b2_ref,
                   ln_ref, lnf_ref,
                   out_ref,
                   *, num_layers, num_heads, batch, tgt_len):
    M, C = x_ref.shape                       # M = B*T
    T = tgt_len
    d = C // num_heads

    # add positional embedding (dropout is identity in eval mode)
    x = x_ref[...] + pos_ref[...]            # (M, C)

    # buffered_future_mask: strictly-upper-triangular -inf mask, per (T, T) block
    row = lax.broadcasted_iota(jnp.int32, (T, T), 0)
    col = lax.broadcasted_iota(jnp.int32, (T, T), 1)
    allowed = col <= row

    for l in range(num_layers):
        # -------- self-attention block (pre-norm) --------
        residual = x
        h = _layer_norm(x, ln_ref[l, 0], ln_ref[l, 1])
        # fused Q/K/V projection; the d**-0.5 scaling is folded into wq/bq wrapper-side
        qkv = jnp.dot(h, wqkv_ref[l], preferred_element_type=jnp.float32) + bqkv_ref[l][None, :]
        q = qkv[:, 0 * C:1 * C]
        k = qkv[:, 1 * C:2 * C]
        v = qkv[:, 2 * C:3 * C]

        attn_batches = []
        for b in range(batch):                           # static unroll over batch
            rows = slice(b * T, (b + 1) * T)
            qb, kb, vb = q[rows], k[rows], v[rows]
            heads = []
            for hd in range(num_heads):                  # static unroll over heads
                sl = slice(hd * d, (hd + 1) * d)
                scores = lax.dot_general(qb[:, sl], kb[:, sl], (((1,), (1,)), ((), ())),
                                         preferred_element_type=jnp.float32)   # (T, T)
                scores = jnp.where(allowed, scores, -1e30)
                m = jnp.max(scores, axis=-1, keepdims=True)
                e = jnp.exp(scores - m)
                p = e * pl.reciprocal(jnp.sum(e, axis=-1, keepdims=True), approx=True)
                heads.append(jnp.dot(p, vb[:, sl], preferred_element_type=jnp.float32))
            attn_batches.append(jnp.concatenate(heads, axis=-1))    # (T, C)
        attn = jnp.concatenate(attn_batches, axis=0)                # (M, C)
        # single output projection over the concatenated heads
        x = residual + jnp.dot(attn, wo_ref[l], preferred_element_type=jnp.float32) \
            + bo_ref[l][None, :]

        # -------- feed-forward block (pre-norm) --------
        residual = x
        h = _layer_norm(x, ln_ref[l, 2], ln_ref[l, 3])
        h = jnp.maximum(jnp.dot(h, w1_ref[l], preferred_element_type=jnp.float32)
                        + b1_ref[l][None, :], 0.0)
        x = residual + jnp.dot(h, w2_ref[l], preferred_element_type=jnp.float32) \
            + b2_ref[l][None, :]

    # final layer norm (decoder_normalize_before and final_norm=True)
    out_ref[...] = _layer_norm(x, lnf_ref[0], lnf_ref[1])


# --------------------------------- wrapper ---------------------------------
def prepare_params(params, num_heads):
    """Fuse / pack raw parameters into the kernel's packed layout."""
    C = params["wq"].shape[-1]
    d = C // num_heads
    s = d ** -0.5
    wqkv = jnp.concatenate([params["wq"] * s, params["wk"], params["wv"]], axis=-1)   # (L, C, 3C)
    bqkv = jnp.concatenate([params["bq"] * s, params["bk"], params["bv"]], axis=-1)   # (L, 3C)
    ln = jnp.stack([params["ln1g"], params["ln1b"],
                    params["ln2g"], params["ln2b"]], axis=1)                          # (L, 4, C)
    lnf = jnp.stack([params["lnfg"], params["lnfb"]], axis=0)                         # (2, C)
    return {
        "wqkv": wqkv, "bqkv": bqkv,
        "wo": params["wo"], "bo": params["bo"],
        "w1": params["w1"], "b1": params["b1"],
        "w2": params["w2"], "b2": params["b2"],
        "ln": ln, "lnf": lnf,
    }


def sent_transformer_decoder(prev_output_tokens, prev_output_rep, params, *, num_heads):
    """Returns (x, extra) like the PyTorch module (eval mode, encoder_out=None,
    incremental_state=None, no_encoder_attn=True)."""
    B, T, C = prev_output_rep.shape
    pp = prepare_params(params, num_heads)
    L = pp["wqkv"].shape[0]

    pos = jnp.tile(sinusoidal_positions(T, C), (B, 1))       # (B*T, C)
    x_flat = prev_output_rep.reshape(B * T, C)               # pure layout reshape

    def full_spec(shape):
        nd = len(shape)
        return pl.BlockSpec(shape, lambda i, _nd=nd: (0,) * _nd)

    operands = (x_flat, pos,
                pp["wqkv"], pp["bqkv"], pp["wo"], pp["bo"],
                pp["w1"], pp["b1"], pp["w2"], pp["b2"],
                pp["ln"], pp["lnf"])

    out_flat = pl.pallas_call(
        partial(decoder_kernel, num_layers=L, num_heads=num_heads, batch=B, tgt_len=T),
        out_shape=jax.ShapeDtypeStruct((B * T, C), jnp.float32),
        grid=(1,),                                            # single step: B folded into M
        in_specs=[full_spec(a.shape) for a in operands],
        out_specs=full_spec((B * T, C)),
        compiler_params=pltpu.CompilerParams(dimension_semantics=("arbitrary",)),
    )(*operands)

    # TODO(synk): inner_states (per-layer activations) and attn weights are not
    # materialized; with no_encoder_attn fairseq returns attn=None anyway.
    return out_flat.reshape(B, T, C), {"attn": None, "inner_states": None}


# --------------------------------- params / reference ---------------------------------
def init_params(key, L, C, F):
    ks = jax.random.split(key, 8)
    s = 0.1
    return {
        "wq": s * jax.random.normal(ks[0], (L, C, C), jnp.float32),
        "bq": jnp.zeros((L, C), jnp.float32),
        "wk": s * jax.random.normal(ks[1], (L, C, C), jnp.float32),
        "bk": jnp.zeros((L, C), jnp.float32),
        "wv": s * jax.random.normal(ks[2], (L, C, C), jnp.float32),
        "bv": jnp.zeros((L, C), jnp.float32),
        "wo": s * jax.random.normal(ks[3], (L, C, C), jnp.float32),
        "bo": jnp.zeros((L, C), jnp.float32),
        "ln1g": jnp.ones((L, C), jnp.float32),
        "ln1b": jnp.zeros((L, C), jnp.float32),
        "w1": s * jax.random.normal(ks[4], (L, C, F), jnp.float32),
        "b1": jnp.zeros((L, F), jnp.float32),
        "w2": s * jax.random.normal(ks[5], (L, F, C), jnp.float32),
        "b2": jnp.zeros((L, C), jnp.float32),
        "ln2g": jnp.ones((L, C), jnp.float32),
        "ln2b": jnp.zeros((L, C), jnp.float32),
        "lnfg": jnp.ones((C,), jnp.float32),
        "lnfb": jnp.zeros((C,), jnp.float32),
    }


def reference(prev_output_rep, params, num_heads):
    """Pure-JAX reference of the same forward pass (for sanity checking)."""
    B, T, C = prev_output_rep.shape
    d = C // num_heads
    L = params["wq"].shape[0]
    x = prev_output_rep + sinusoidal_positions(T, C)[None]
    allowed = (jnp.arange(T)[None, :] <= jnp.arange(T)[:, None])
    for l in range(L):
        residual = x
        h = _layer_norm(x, params["ln1g"][l], params["ln1b"][l])
        q = h @ params["wq"][l] + params["bq"][l]
        k = h @ params["wk"][l] + params["bk"][l]
        v = h @ params["wv"][l] + params["bv"][l]
        q = q * d ** -0.5
        q = q.reshape(B, T, num_heads, d)
        k = k.reshape(B, T, num_heads, d)
        v = v.reshape(B, T, num_heads, d)
        scores = jnp.einsum("bthd,bshd->bhts", q, k)
        scores = jnp.where(allowed[None, None], scores, -1e30)
        p = jax.nn.softmax(scores, axis=-1)
        o = jnp.einsum("bhts,bshd->bthd", p, v).reshape(B, T, C)
        x = residual + o @ params["wo"][l] + params["bo"][l]
        residual = x
        h = _layer_norm(x, params["ln2g"][l], params["ln2b"][l])
        h = jax.nn.relu(h @ params["w1"][l] + params["b1"][l])
        x = residual + h @ params["w2"][l] + params["b2"][l]
    return _layer_norm(x, params["lnfg"], params["lnfb"])


# --------------------------------- main ---------------------------------
if __name__ == "__main__":
    B, T, C, H, F, L = 2, 8, 32, 4, 64, 2

    key = jax.random.PRNGKey(0)
    k_tok, k_rep, k_par = jax.random.split(key, 3)
    # tokens only feed the positional embedding; keep them non-padding (> 0)
    prev_output_tokens = jax.random.randint(k_tok, (B, T), 1, 100, dtype=jnp.int32)
    prev_output_rep = jax.random.normal(k_rep, (B, T, C), jnp.float32)
    params = init_params(k_par, L, C, F)

    out, extra = sent_transformer_decoder(prev_output_tokens, prev_output_rep,
                                          params, num_heads=H)
    out = jax.block_until_ready(out)
    assert out.shape == (B, T, C) and out.dtype == jnp.float32

    ref = jax.block_until_ready(reference(prev_output_rep, params, H))
    max_err = float(jnp.max(jnp.abs(out - ref)))
    assert max_err < 5e-2, f"mismatch vs reference, max abs err = {max_err}"

    print("KERNEL_OK")
</pallas_src>

<mosaic_0001>
module attributes {stable_mosaic.version = 11 : i64} {
  func.func @decoder_kernel(%arg0: i32, %arg1: memref<16x32xf32, #tpu.memory_space<vmem>>, %arg2: memref<16x32xf32, #tpu.memory_space<vmem>>, %arg3: memref<2x32x96xf32, #tpu.memory_space<vmem>>, %arg4: memref<2x96xf32, #tpu.memory_space<vmem>>, %arg5: memref<2x32x32xf32, #tpu.memory_space<vmem>>, %arg6: memref<2x32xf32, #tpu.memory_space<vmem>>, %arg7: memref<2x32x64xf32, #tpu.memory_space<vmem>>, %arg8: memref<2x64xf32, #tpu.memory_space<vmem>>, %arg9: memref<2x64x32xf32, #tpu.memory_space<vmem>>, %arg10: memref<2x32xf32, #tpu.memory_space<vmem>>, %arg11: memref<2x4x32xf32, #tpu.memory_space<vmem>>, %arg12: memref<2x32xf32, #tpu.memory_space<vmem>>, %arg13: memref<16x32xf32, #tpu.memory_space<vmem>>) attributes {dimension_semantics = [#tpu.dimension_semantics<arbitrary>], iteration_bounds = array<i64: 1>, scalar_prefetch = 0 : i64, scratch_operands = 0 : i64, tpu.core_type = #tpu.core_type<tc>, window_params = [{pipeline_mode = #tpu.pipeline_mode<synchronous>, transform_indices = @transform_0, window_bounds = array<i64: 16, 32>}, {pipeline_mode = #tpu.pipeline_mode<synchronous>, transform_indices = @transform_1, window_bounds = array<i64: 16, 32>}, {pipeline_mode = #tpu.pipeline_mode<synchronous>, transform_indices = @transform_2, window_bounds = array<i64: 2, 32, 96>}, {pipeline_mode = #tpu.pipeline_mode<synchronous>, transform_indices = @transform_3, window_bounds = array<i64: 2, 96>}, {pipeline_mode = #tpu.pipeline_mode<synchronous>, transform_indices = @transform_4, window_bounds = array<i64: 2, 32, 32>}, {pipeline_mode = #tpu.pipeline_mode<synchronous>, transform_indices = @transform_5, window_bounds = array<i64: 2, 32>}, {pipeline_mode = #tpu.pipeline_mode<synchronous>, transform_indices = @transform_6, window_bounds = array<i64: 2, 32, 64>}, {pipeline_mode = #tpu.pipeline_mode<synchronous>, transform_indices = @transform_7, window_bounds = array<i64: 2, 64>}, {pipeline_mode = #tpu.pipeline_mode<synchronous>, transform_indices = @transform_8, window_bounds = array<i64: 2, 64, 32>}, {pipeline_mode = #tpu.pipeline_mode<synchronous>, transform_indices = @transform_9, window_bounds = array<i64: 2, 32>}, {pipeline_mode = #tpu.pipeline_mode<synchronous>, transform_indices = @transform_10, window_bounds = array<i64: 2, 4, 32>}, {pipeline_mode = #tpu.pipeline_mode<synchronous>, transform_indices = @transform_11, window_bounds = array<i64: 2, 32>}, {pipeline_mode = #tpu.pipeline_mode<synchronous>, transform_indices = @transform_12, window_bounds = array<i64: 16, 32>}]} {
    %c0 = arith.constant 0 : index
    %c0_0 = arith.constant 0 : index
    %0 = vector.load %arg1[%c0, %c0_0] : memref<16x32xf32, #tpu.memory_space<vmem>>, vector<16x32xf32>
    %c0_1 = arith.constant 0 : index
    %c0_2 = arith.constant 0 : index
    %1 = vector.load %arg2[%c0_1, %c0_2] : memref<16x32xf32, #tpu.memory_space<vmem>>, vector<16x32xf32>
    %2 = arith.addf %0, %1 : vector<16x32xf32>
    %3 = tpu.iota {dimensions = array<i32: 0>} : vector<8x8xi32>
    %4 = tpu.iota {dimensions = array<i32: 1>} : vector<8x8xi32>
    %5 = arith.cmpi sle, %4, %3 : vector<8x8xi32>
    %c0_3 = arith.constant 0 : index
    %c0_4 = arith.constant 0 : index
    %c0_5 = arith.constant 0 : index
    %6 = vector.load %arg11[%c0_3, %c0_4, %c0_5] : memref<2x4x32xf32, #tpu.memory_space<vmem>>, vector<1x1x32xf32>
    %7 = vector.shape_cast %6 : vector<1x1x32xf32> to vector<32xf32>
    %c0_6 = arith.constant 0 : index
    %c1 = arith.constant 1 : index
    %c0_7 = arith.constant 0 : index
    %8 = vector.load %arg11[%c0_6, %c1, %c0_7] : memref<2x4x32xf32, #tpu.memory_space<vmem>>, vector<1x1x32xf32>
    %9 = vector.shape_cast %8 : vector<1x1x32xf32> to vector<32xf32>
    %cst = arith.constant dense<0.000000e+00> : vector<16xf32>
    %10 = vector.multi_reduction <add>, %2, %cst [1] : vector<16x32xf32> to vector<16xf32>
    %11 = vector.shape_cast %10 : vector<16xf32> to vector<16x1xf32>
    %cst_8 = arith.constant 3.200000e+01 : f32
    %12 = vector.broadcast %cst_8 : f32 to vector<16x1xf32>
    %13 = arith.divf %11, %12 : vector<16x1xf32>
    %14 = vector.broadcast %13 : vector<16x1xf32> to vector<16x32xf32>
    %15 = arith.subf %2, %14 : vector<16x32xf32>
    %16 = arith.mulf %15, %15 : vector<16x32xf32>
    %cst_9 = arith.constant dense<0.000000e+00> : vector<16xf32>
    %17 = vector.multi_reduction <add>, %16, %cst_9 [1] : vector<16x32xf32> to vector<16xf32>
    %18 = vector.shape_cast %17 : vector<16xf32> to vector<16x1xf32>
    %cst_10 = arith.constant 3.200000e+01 : f32
    %19 = vector.broadcast %cst_10 : f32 to vector<16x1xf32>
    %20 = arith.divf %18, %19 : vector<16x1xf32>
    %cst_11 = arith.constant 9.99999974E-6 : f32
    %21 = vector.broadcast %cst_11 : f32 to vector<16x1xf32>
    %22 = arith.addf %20, %21 : vector<16x1xf32>
    %23 = math.rsqrt %22 : vector<16x1xf32>
    %24 = vector.broadcast %23 : vector<16x1xf32> to vector<16x32xf32>
    %25 = arith.mulf %15, %24 : vector<16x32xf32>
    %26 = vector.shape_cast %7 : vector<32xf32> to vector<1x32xf32>
    %27 = vector.broadcast %26 : vector<1x32xf32> to vector<16x32xf32>
    %28 = arith.mulf %25, %27 : vector<16x32xf32>
    %29 = vector.shape_cast %9 : vector<32xf32> to vector<1x32xf32>
    %30 = vector.broadcast %29 : vector<1x32xf32> to vector<16x32xf32>
    %31 = arith.addf %28, %30 : vector<16x32xf32>
    %c0_12 = arith.constant 0 : index
    %c0_13 = arith.constant 0 : index
    %c0_14 = arith.constant 0 : index
    %32 = vector.load %arg3[%c0_12, %c0_13, %c0_14] : memref<2x32x96xf32, #tpu.memory_space<vmem>>, vector<1x32x96xf32>
    %33 = vector.shape_cast %32 : vector<1x32x96xf32> to vector<32x96xf32>
    %cst_15 = arith.constant dense<0.000000e+00> : vector<16x96xf32>
    %34 = tpu.matmul %31, %33, %cst_15 {dimension_numbers = #tpu.dot_dimension_numbers<[1], [0], [0], [1], [0, 0, 1, 1], [], []>} : vector<16x32xf32>, vector<32x96xf32>, vector<16x96xf32> -> vector<16x96xf32>
    %c0_16 = arith.constant 0 : index
    %c0_17 = arith.constant 0 : index
    %35 = vector.load %arg4[%c0_16, %c0_17] : memref<2x96xf32, #tpu.memory_space<vmem>>, vector<1x96xf32>
    %36 = vector.shape_cast %35 : vector<1x96xf32> to vector<96xf32>
    %37 = vector.shape_cast %36 : vector<96xf32> to vector<1x96xf32>
    %38 = vector.broadcast %37 : vector<1x96xf32> to vector<16x96xf32>
    %39 = arith.addf %34, %38 : vector<16x96xf32>
    %40 = vector.extract_strided_slice %39 {offsets = [0, 0], sizes = [16, 32], strides = [1, 1]} : vector<16x96xf32> to vector<16x32xf32>
    %41 = vector.extract_strided_slice %39 {offsets = [0, 32], sizes = [16, 32], strides = [1, 1]} : vector<16x96xf32> to vector<16x32xf32>
    %42 = vector.extract_strided_slice %39 {offsets = [0, 64], sizes = [16, 32], strides = [1, 1]} : vector<16x96xf32> to vector<16x32xf32>
    %43 = vector.extract_strided_slice %40 {offsets = [0, 0], sizes = [8, 32], strides = [1, 1]} : vector<16x32xf32> to vector<8x32xf32>
    %44 = vector.extract_strided_slice %41 {offsets = [0, 0], sizes = [8, 32], strides = [1, 1]} : vector<16x32xf32> to vector<8x32xf32>
    %45 = vector.extract_strided_slice %42 {offsets = [0, 0], sizes = [8, 32], strides = [1, 1]} : vector<16x32xf32> to vector<8x32xf32>
    %46 = vector.extract_strided_slice %43 {offsets = [0, 0], sizes = [8, 8], strides = [1, 1]} : vector<8x32xf32> to vector<8x8xf32>
    %47 = vector.extract_strided_slice %44 {offsets = [0, 0], sizes = [8, 8], strides = [1, 1]} : vector<8x32xf32> to vector<8x8xf32>
    %cst_18 = arith.constant dense<0.000000e+00> : vector<8x8xf32>
    %48 = tpu.matmul %46, %47, %cst_18 {dimension_numbers = #tpu.dot_dimension_numbers<[1], [1], [0], [0], [0, 0, 1, 0], [], []>} : vector<8x8xf32>, vector<8x8xf32>, vector<8x8xf32> -> vector<8x8xf32>
    %cst_19 = arith.constant -1.000000e+30 : f32
    %49 = vector.broadcast %cst_19 : f32 to vector<8x8xf32>
    %50 = arith.select %5, %48, %49 : vector<8x8xi1>, vector<8x8xf32>
    %cst_20 = arith.constant dense<0xFF800000> : vector<8xf32>
    %51 = vector.multi_reduction <maximumf>, %50, %cst_20 [1] : vector<8x8xf32> to vector<8xf32>
    %52 = vector.shape_cast %51 : vector<8xf32> to vector<8x1xf32>
    %53 = vector.broadcast %52 : vector<8x1xf32> to vector<8x8xf32>
    %54 = arith.subf %50, %53 : vector<8x8xf32>
    %55 = math.exp %54 : vector<8x8xf32>
    %cst_21 = arith.constant dense<0.000000e+00> : vector<8xf32>
    %56 = vector.multi_reduction <add>, %55, %cst_21 [1] : vector<8x8xf32> to vector<8xf32>
    %57 = vector.shape_cast %56 : vector<8xf32> to vector<8x1xf32>
    %58 = tpu.reciprocal %57 {approx = true} : vector<8x1xf32> -> vector<8x1xf32>
    %59 = vector.broadcast %58 : vector<8x1xf32> to vector<8x8xf32>
    %60 = arith.mulf %55, %59 : vector<8x8xf32>
    %61 = vector.extract_strided_slice %45 {offsets = [0, 0], sizes = [8, 8], strides = [1, 1]} : vector<8x32xf32> to vector<8x8xf32>
    %cst_22 = arith.constant dense<0.000000e+00> : vector<8x8xf32>
    %62 = tpu.matmul %60, %61, %cst_22 {dimension_numbers = #tpu.dot_dimension_numbers<[1], [0], [0], [1], [0, 0, 1, 1], [], []>} : vector<8x8xf32>, vector<8x8xf32>, vector<8x8xf32> -> vector<8x8xf32>
    %63 = vector.extract_strided_slice %43 {offsets = [0, 8], sizes = [8, 8], strides = [1, 1]} : vector<8x32xf32> to vector<8x8xf32>
    %64 = vector.extract_strided_slice %44 {offsets = [0, 8], sizes = [8, 8], strides = [1, 1]} : vector<8x32xf32> to vector<8x8xf32>
    %cst_23 = arith.constant dense<0.000000e+00> : vector<8x8xf32>
    %65 = tpu.matmul %63, %64, %cst_23 {dimension_numbers = #tpu.dot_dimension_numbers<[1], [1], [0], [0], [0, 0, 1, 0], [], []>} : vector<8x8xf32>, vector<8x8xf32>, vector<8x8xf32> -> vector<8x8xf32>
    %cst_24 = arith.constant -1.000000e+30 : f32
    %66 = vector.broadcast %cst_24 : f32 to vector<8x8xf32>
    %67 = arith.select %5, %65, %66 : vector<8x8xi1>, vector<8x8xf32>
    %cst_25 = arith.constant dense<0xFF800000> : vector<8xf32>
    %68 = vector.multi_reduction <maximumf>, %67, %cst_25 [1] : vector<8x8xf32> to vector<8xf32>
    %69 = vector.shape_cast %68 : vector<8xf32> to vector<8x1xf32>
    %70 = vector.broadcast %69 : vector<8x1xf32> to vector<8x8xf32>
    %71 = arith.subf %67, %70 : vector<8x8xf32>
    %72 = math.exp %71 : vector<8x8xf32>
    %cst_26 = arith.constant dense<0.000000e+00> : vector<8xf32>
    %73 = vector.multi_reduction <add>, %72, %cst_26 [1] : vector<8x8xf32> to vector<8xf32>
    %74 = vector.shape_cast %73 : vector<8xf32> to vector<8x1xf32>
    %75 = tpu.reciprocal %74 {approx = true} : vector<8x1xf32> -> vector<8x1xf32>
    %76 = vector.broadcast %75 : vector<8x1xf32> to vector<8x8xf32>
    %77 = arith.mulf %72, %76 : vector<8x8xf32>
    %78 = vector.extract_strided_slice %45 {offsets = [0, 8], sizes = [8, 8], strides = [1, 1]} : vector<8x32xf32> to vector<8x8xf32>
    %cst_27 = arith.constant dense<0.000000e+00> : vector<8x8xf32>
    %79 = tpu.matmul %77, %78, %cst_27 {dimension_numbers = #tpu.dot_dimension_numbers<[1], [0], [0], [1], [0, 0, 1, 1], [], []>} : vector<8x8xf32>, vector<8x8xf32>, vector<8x8xf32> -> vector<8x8xf32>
    %80 = vector.extract_strided_slice %43 {offsets = [0, 16], sizes = [8, 8], strides = [1, 1]} : vector<8x32xf32> to vector<8x8xf32>
    %81 = vector.extract_strided_slice %44 {offsets = [0, 16], sizes = [8, 8], strides = [1, 1]} : vector<8x32xf32> to vector<8x8xf32>
    %cst_28 = arith.constant dense<0.000000e+00> : vector<8x8xf32>
    %82 = tpu.matmul %80, %81, %cst_28 {dimension_numbers = #tpu.dot_dimension_numbers<[1], [1], [0], [0], [0, 0, 1, 0], [], []>} : vector<8x8xf32>, vector<8x8xf32>, vector<8x8xf32> -> vector<8x8xf32>
    %cst_29 = arith.constant -1.000000e+30 : f32
    %83 = vector.broadcast %cst_29 : f32 to vector<8x8xf32>
    %84 = arith.select %5, %82, %83 : vector<8x8xi1>, vector<8x8xf32>
    %cst_30 = arith.constant dense<0xFF800000> : vector<8xf32>
    %85 = vector.multi_reduction <maximumf>, %84, %cst_30 [1] : vector<8x8xf32> to vector<8xf32>
    %86 = vector.shape_cast %85 : vector<8xf32> to vector<8x1xf32>
    %87 = vector.broadcast %86 : vector<8x1xf32> to vector<8x8xf32>
    %88 = arith.subf %84, %87 : vector<8x8xf32>
    %89 = math.exp %88 : vector<8x8xf32>
    %cst_31 = arith.constant dense<0.000000e+00> : vector<8xf32>
    %90 = vector.multi_reduction <add>, %89, %cst_31 [1] : vector<8x8xf32> to vector<8xf32>
    %91 = vector.shape_cast %90 : vector<8xf32> to vector<8x1xf32>
    %92 = tpu.reciprocal %91 {approx = true} : vector<8x1xf32> -> vector<8x1xf32>
    %93 = vector.broadcast %92 : vector<8x1xf32> to vector<8x8xf32>
    %94 = arith.mulf %89, %93 : vector<8x8xf32>
    %95 = vector.extract_strided_slice %45 {offsets = [0, 16], sizes = [8, 8], strides = [1, 1]} : vector<8x32xf32> to vector<8x8xf32>
    %cst_32 = arith.constant dense<0.000000e+00> : vector<8x8xf32>
    %96 = tpu.matmul %94, %95, %cst_32 {dimension_numbers = #tpu.dot_dimension_numbers<[1], [0], [0], [1], [0, 0, 1, 1], [], []>} : vector<8x8xf32>, vector<8x8xf32>, vector<8x8xf32> -> vector<8x8xf32>
    %97 = vector.extract_strided_slice %43 {offsets = [0, 24], sizes = [8, 8], strides = [1, 1]} : vector<8x32xf32> to vector<8x8xf32>
    %98 = vector.extract_strided_slice %44 {offsets = [0, 24], sizes = [8, 8], strides = [1, 1]} : vector<8x32xf32> to vector<8x8xf32>
    %cst_33 = arith.constant dense<0.000000e+00> : vector<8x8xf32>
    %99 = tpu.matmul %97, %98, %cst_33 {dimension_numbers = #tpu.dot_dimension_numbers<[1], [1], [0], [0], [0, 0, 1, 0], [], []>} : vector<8x8xf32>, vector<8x8xf32>, vector<8x8xf32> -> vector<8x8xf32>
    %cst_34 = arith.constant -1.000000e+30 : f32
    %100 = vector.broadcast %cst_34 : f32 to vector<8x8xf32>
    %101 = arith.select %5, %99, %100 : vector<8x8xi1>, vector<8x8xf32>
    %cst_35 = arith.constant dense<0xFF800000> : vector<8xf32>
    %102 = vector.multi_reduction <maximumf>, %101, %cst_35 [1] : vector<8x8xf32> to vector<8xf32>
    %103 = vector.shape_cast %102 : vector<8xf32> to vector<8x1xf32>
    %104 = vector.broadcast %103 : vector<8x1xf32> to vector<8x8xf32>
    %105 = arith.subf %101, %104 : vector<8x8xf32>
    %106 = math.exp %105 : vector<8x8xf32>
    %cst_36 = arith.constant dense<0.000000e+00> : vector<8xf32>
    %107 = vector.multi_reduction <add>, %106, %cst_36 [1] : vector<8x8xf32> to vector<8xf32>
    %108 = vector.shape_cast %107 : vector<8xf32> to vector<8x1xf32>
    %109 = tpu.reciprocal %108 {approx = true} : vector<8x1xf32> -> vector<8x1xf32>
    %110 = vector.broadcast %109 : vector<8x1xf32> to vector<8x8xf32>
    %111 = arith.mulf %106, %110 : vector<8x8xf32>
    %112 = vector.extract_strided_slice %45 {offsets = [0, 24], sizes = [8, 8], strides = [1, 1]} : vector<8x32xf32> to vector<8x8xf32>
    %cst_37 = arith.constant dense<0.000000e+00> : vector<8x8xf32>
    %113 = tpu.matmul %111, %112, %cst_37 {dimension_numbers = #tpu.dot_dimension_numbers<[1], [0], [0], [1], [0, 0, 1, 1], [], []>} : vector<8x8xf32>, vector<8x8xf32>, vector<8x8xf32> -> vector<8x8xf32>
    %114 = tpu.concatenate %62, %79, %96, %113 in 1 : vector<8x8xf32>, vector<8x8xf32>, vector<8x8xf32>, vector<8x8xf32> -> vector<8x32xf32>
    %115 = vector.extract_strided_slice %40 {offsets = [8, 0], sizes = [8, 32], strides = [1, 1]} : vector<16x32xf32> to vector<8x32xf32>
    %116 = vector.extract_strided_slice %41 {offsets = [8, 0], sizes = [8, 32], strides = [1, 1]} : vector<16x32xf32> to vector<8x32xf32>
    %117 = vector.extract_strided_slice %42 {offsets = [8, 0], sizes = [8, 32], strides = [1, 1]} : vector<16x32xf32> to vector<8x32xf32>
    %118 = vector.extract_strided_slice %115 {offsets = [0, 0], sizes = [8, 8], strides = [1, 1]} : vector<8x32xf32> to vector<8x8xf32>
    %119 = vector.extract_strided_slice %116 {offsets = [0, 0], sizes = [8, 8], strides = [1, 1]} : vector<8x32xf32> to vector<8x8xf32>
    %cst_38 = arith.constant dense<0.000000e+00> : vector<8x8xf32>
    %120 = tpu.matmul %118, %119, %cst_38 {dimension_numbers = #tpu.dot_dimension_numbers<[1], [1], [0], [0], [0, 0, 1, 0], [], []>} : vector<8x8xf32>, vector<8x8xf32>, vector<8x8xf32> -> vector<8x8xf32>
    %cst_39 = arith.constant -1.000000e+30 : f32
    %121 = vector.broadcast %cst_39 : f32 to vector<8x8xf32>
    %122 = arith.select %5, %120, %121 : vector<8x8xi1>, vector<8x8xf32>
    %cst_40 = arith.constant dense<0xFF800000> : vector<8xf32>
    %123 = vector.multi_reduction <maximumf>, %122, %cst_40 [1] : vector<8x8xf32> to vector<8xf32>
    %124 = vector.shape_cast %123 : vector<8xf32> to vector<8x1xf32>
    %125 = vector.broadcast %124 : vector<8x1xf32> to vector<8x8xf32>
    %126 = arith.subf %122, %125 : vector<8x8xf32>
    %127 = math.exp %126 : vector<8x8xf32>
    %cst_41 = arith.constant dense<0.000000e+00> : vector<8xf32>
    %128 = vector.multi_reduction <add>, %127, %cst_41 [1] : vector<8x8xf32> to vector<8xf32>
    %129 = vector.shape_cast %128 : vector<8xf32> to vector<8x1xf32>
    %130 = tpu.reciprocal %129 {approx = true} : vector<8x1xf32> -> vector<8x1xf32>
    %131 = vector.broadcast %130 : vector<8x1xf32> to vector<8x8xf32>
    %132 = arith.mulf %127, %131 : vector<8x8xf32>
    %133 = vector.extract_strided_slice %117 {offsets = [0, 0], sizes = [8, 8], strides = [1, 1]} : vector<8x32xf32> to vector<8x8xf32>
    %cst_42 = arith.constant dense<0.000000e+00> : vector<8x8xf32>
    %134 = tpu.matmul %132, %133, %cst_42 {dimension_numbers = #tpu.dot_dimension_numbers<[1], [0], [0], [1], [0, 0, 1, 1], [], []>} : vector<8x8xf32>, vector<8x8xf32>, vector<8x8xf32> -> vector<8x8xf32>
    %135 = vector.extract_strided_slice %115 {offsets = [0, 8], sizes = [8, 8], strides = [1, 1]} : vector<8x32xf32> to vector<8x8xf32>
    %136 = vector.extract_strided_slice %116 {offsets = [0, 8], sizes = [8, 8], strides = [1, 1]} : vector<8x32xf32> to vector<8x8xf32>
    %cst_43 = arith.constant dense<0.000000e+00> : vector<8x8xf32>
    %137 = tpu.matmul %135, %136, %cst_43 {dimension_numbers = #tpu.dot_dimension_numbers<[1], [1], [0], [0], [0, 0, 1, 0], [], []>} : vector<8x8xf32>, vector<8x8xf32>, vector<8x8xf32> -> vector<8x8xf32>
    %cst_44 = arith.constant -1.000000e+30 : f32
    %138 = vector.broadcast %cst_44 : f32 to vector<8x8xf32>
    %139 = arith.select %5, %137, %138 : vector<8x8xi1>, vector<8x8xf32>
    %cst_45 = arith.constant dense<0xFF800000> : vector<8xf32>
    %140 = vector.multi_reduction <maximumf>, %139, %cst_45 [1] : vector<8x8xf32> to vector<8xf32>
    %141 = vector.shape_cast %140 : vector<8xf32> to vector<8x1xf32>
    %142 = vector.broadcast %141 : vector<8x1xf32> to vector<8x8xf32>
    %143 = arith.subf %139, %142 : vector<8x8xf32>
    %144 = math.exp %143 : vector<8x8xf32>
    %cst_46 = arith.constant dense<0.000000e+00> : vector<8xf32>
    %145 = vector.multi_reduction <add>, %144, %cst_46 [1] : vector<8x8xf32> to vector<8xf32>
    %146 = vector.shape_cast %145 : vector<8xf32> to vector<8x1xf32>
    %147 = tpu.reciprocal %146 {approx = true} : vector<8x1xf32> -> vector<8x1xf32>
    %148 = vector.broadcast %147 : vector<8x1xf32> to vector<8x8xf32>
    %149 = arith.mulf %144, %148 : vector<8x8xf32>
    %150 = vector.extract_strided_slice %117 {offsets = [0, 8], sizes = [8, 8], strides = [1, 1]} : vector<8x32xf32> to vector<8x8xf32>
    %cst_47 = arith.constant dense<0.000000e+00> : vector<8x8xf32>
    %151 = tpu.matmul %149, %150, %cst_47 {dimension_numbers = #tpu.dot_dimension_numbers<[1], [0], [0], [1], [0, 0, 1, 1], [], []>} : vector<8x8xf32>, vector<8x8xf32>, vector<8x8xf32> -> vector<8x8xf32>
    %152 = vector.extract_strided_slice %115 {offsets = [0, 16], sizes = [8, 8], strides = [1, 1]} : vector<8x32xf32> to vector<8x8xf32>
    %153 = vector.extract_strided_slice %116 {offsets = [0, 16], sizes = [8, 8], strides = [1, 1]} : vector<8x32xf32> to vector<8x8xf32>
    %cst_48 = arith.constant dense<0.000000e+00> : vector<8x8xf32>
    %154 = tpu.matmul %152, %153, %cst_48 {dimension_numbers = #tpu.dot_dimension_numbers<[1], [1], [0], [0], [0, 0, 1, 0], [], []>} : vector<8x8xf32>, vector<8x8xf32>, vector<8x8xf32> -> vector<8x8xf32>
    %cst_49 = arith.constant -1.000000e+30 : f32
    %155 = vector.broadcast %cst_49 : f32 to vector<8x8xf32>
    %156 = arith.select %5, %154, %155 : vector<8x8xi1>, vector<8x8xf32>
    %cst_50 = arith.constant dense<0xFF800000> : vector<8xf32>
    %157 = vector.multi_reduction <maximumf>, %156, %cst_50 [1] : vector<8x8xf32> to vector<8xf32>
    %158 = vector.shape_cast %157 : vector<8xf32> to vector<8x1xf32>
    %159 = vector.broadcast %158 : vector<8x1xf32> to vector<8x8xf32>
    %160 = arith.subf %156, %159 : vector<8x8xf32>
    %161 = math.exp %160 : vector<8x8xf32>
    %cst_51 = arith.constant dense<0.000000e+00> : vector<8xf32>
    %162 = vector.multi_reduction <add>, %161, %cst_51 [1] : vector<8x8xf32> to vector<8xf32>
    %163 = vector.shape_cast %162 : vector<8xf32> to vector<8x1xf32>
    %164 = tpu.reciprocal %163 {approx = true} : vector<8x1xf32> -> vector<8x1xf32>
    %165 = vector.broadcast %164 : vector<8x1xf32> to vector<8x8xf32>
    %166 = arith.mulf %161, %165 : vector<8x8xf32>
    %167 = vector.extract_strided_slice %117 {offsets = [0, 16], sizes = [8, 8], strides = [1, 1]} : vector<8x32xf32> to vector<8x8xf32>
    %cst_52 = arith.constant dense<0.000000e+00> : vector<8x8xf32>
    %168 = tpu.matmul %166, %167, %cst_52 {dimension_numbers = #tpu.dot_dimension_numbers<[1], [0], [0], [1], [0, 0, 1, 1], [], []>} : vector<8x8xf32>, vector<8x8xf32>, vector<8x8xf32> -> vector<8x8xf32>
    %169 = vector.extract_strided_slice %115 {offsets = [0, 24], sizes = [8, 8], strides = [1, 1]} : vector<8x32xf32> to vector<8x8xf32>
    %170 = vector.extract_strided_slice %116 {offsets = [0, 24], sizes = [8, 8], strides = [1, 1]} : vector<8x32xf32> to vector<8x8xf32>
    %cst_53 = arith.constant dense<0.000000e+00> : vector<8x8xf32>
    %171 = tpu.matmul %169, %170, %cst_53 {dimension_numbers = #tpu.dot_dimension_numbers<[1], [1], [0], [0], [0, 0, 1, 0], [], []>} : vector<8x8xf32>, vector<8x8xf32>, vector<8x8xf32> -> vector<8x8xf32>
    %cst_54 = arith.constant -1.000000e+30 : f32
    %172 = vector.broadcast %cst_54 : f32 to vector<8x8xf32>
    %173 = arith.select %5, %171, %172 : vector<8x8xi1>, vector<8x8xf32>
    %cst_55 = arith.constant dense<0xFF800000> : vector<8xf32>
    %174 = vector.multi_reduction <maximumf>, %173, %cst_55 [1] : vector<8x8xf32> to vector<8xf32>
    %175 = vector.shape_cast %174 : vector<8xf32> to vector<8x1xf32>
    %176 = vector.broadcast %175 : vector<8x1xf32> to vector<8x8xf32>
    %177 = arith.subf %173, %176 : vector<8x8xf32>
    %178 = math.exp %177 : vector<8x8xf32>
    %cst_56 = arith.constant dense<0.000000e+00> : vector<8xf32>
    %179 = vector.multi_reduction <add>, %178, %cst_56 [1] : vector<8x8xf32> to vector<8xf32>
    %180 = vector.shape_cast %179 : vector<8xf32> to vector<8x1xf32>
    %181 = tpu.reciprocal %180 {approx = true} : vector<8x1xf32> -> vector<8x1xf32>
    %182 = vector.broadcast %181 : vector<8x1xf32> to vector<8x8xf32>
    %183 = arith.mulf %178, %182 : vector<8x8xf32>
    %184 = vector.extract_strided_slice %117 {offsets = [0, 24], sizes = [8, 8], strides = [1, 1]} : vector<8x32xf32> to vector<8x8xf32>
    %cst_57 = arith.constant dense<0.000000e+00> : vector<8x8xf32>
    %185 = tpu.matmul %183, %184, %cst_57 {dimension_numbers = #tpu.dot_dimension_numbers<[1], [0], [0], [1], [0, 0, 1, 1], [], []>} : vector<8x8xf32>, vector<8x8xf32>, vector<8x8xf32> -> vector<8x8xf32>
    %186 = tpu.concatenate %134, %151, %168, %185 in 1 : vector<8x8xf32>, vector<8x8xf32>, vector<8x8xf32>, vector<8x8xf32> -> vector<8x32xf32>
    %187 = tpu.concatenate %114, %186 in 0 : vector<8x32xf32>, vector<8x32xf32> -> vector<16x32xf32>
    %c0_58 = arith.constant 0 : index
    %c0_59 = arith.constant 0 : index
    %c0_60 = arith.constant 0 : index
    %188 = vector.load %arg5[%c0_58, %c0_59, %c0_60] : memref<2x32x32xf32, #tpu.memory_space<vmem>>, vector<1x32x32xf32>
    %189 = vector.shape_cast %188 : vector<1x32x32xf32> to vector<32x32xf32>
    %cst_61 = arith.constant dense<0.000000e+00> : vector<16x32xf32>
    %190 = tpu.matmul %187, %189, %cst_61 {dimension_numbers = #tpu.dot_dimension_numbers<[1], [0], [0], [1], [0, 0, 1, 1], [], []>} : vector<16x32xf32>, vector<32x32xf32>, vector<16x32xf32> -> vector<16x32xf32>
    %191 = arith.addf %2, %190 : vector<16x32xf32>
    %c0_62 = arith.constant 0 : index
    %c0_63 = arith.constant 0 : index
    %192 = vector.load %arg6[%c0_62, %c0_63] : memref<2x32xf32, #tpu.memory_space<vmem>>, vector<1x32xf32>
    %193 = vector.shape_cast %192 : vector<1x32xf32> to vector<32xf32>
    %194 = vector.shape_cast %193 : vector<32xf32> to vector<1x32xf32>
    %195 = vector.broadcast %194 : vector<1x32xf32> to vector<16x32xf32>
    %196 = arith.addf %191, %195 : vector<16x32xf32>
    %c0_64 = arith.constant 0 : index
    %c2 = arith.constant 2 : index
    %c0_65 = arith.constant 0 : index
    %197 = vector.load %arg11[%c0_64, %c2, %c0_65] : memref<2x4x32xf32, #tpu.memory_space<vmem>>, vector<1x1x32xf32>
    %198 = vector.shape_cast %197 : vector<1x1x32xf32> to vector<32xf32>
    %c0_66 = arith.constant 0 : index
    %c3 = arith.constant 3 : index
    %c0_67 = arith.constant 0 : index
    %199 = vector.load %arg11[%c0_66, %c3, %c0_67] : memref<2x4x32xf32, #tpu.memory_space<vmem>>, vector<1x1x32xf32>
    %200 = vector.shape_cast %199 : vector<1x1x32xf32> to vector<32xf32>
    %cst_68 = arith.constant dense<0.000000e+00> : vector<16xf32>
    %201 = vector.multi_reduction <add>, %196, %cst_68 [1] : vector<16x32xf32> to vector<16xf32>
    %202 = vector.shape_cast %201 : vector<16xf32> to vector<16x1xf32>
    %cst_69 = arith.constant 3.200000e+01 : f32
    %203 = vector.broadcast %cst_69 : f32 to vector<16x1xf32>
    %204 = arith.divf %202, %203 : vector<16x1xf32>
    %205 = vector.broadcast %204 : vector<16x1xf32> to vector<16x32xf32>
    %206 = arith.subf %196, %205 : vector<16x32xf32>
    %207 = arith.mulf %206, %206 : vector<16x32xf32>
    %cst_70 = arith.constant dense<0.000000e+00> : vector<16xf32>
    %208 = vector.multi_reduction <add>, %207, %cst_70 [1] : vector<16x32xf32> to vector<16xf32>
    %209 = vector.shape_cast %208 : vector<16xf32> to vector<16x1xf32>
    %cst_71 = arith.constant 3.200000e+01 : f32
    %210 = vector.broadcast %cst_71 : f32 to vector<16x1xf32>
    %211 = arith.divf %209, %210 : vector<16x1xf32>
    %cst_72 = arith.constant 9.99999974E-6 : f32
    %212 = vector.broadcast %cst_72 : f32 to vector<16x1xf32>
    %213 = arith.addf %211, %212 : vector<16x1xf32>
    %214 = math.rsqrt %213 : vector<16x1xf32>
    %215 = vector.broadcast %214 : vector<16x1xf32> to vector<16x32xf32>
    %216 = arith.mulf %206, %215 : vector<16x32xf32>
    %217 = vector.shape_cast %198 : vector<32xf32> to vector<1x32xf32>
    %218 = vector.broadcast %217 : vector<1x32xf32> to vector<16x32xf32>
    %219 = arith.mulf %216, %218 : vector<16x32xf32>
    %220 = vector.shape_cast %200 : vector<32xf32> to vector<1x32xf32>
    %221 = vector.broadcast %220 : vector<1x32xf32> to vector<16x32xf32>
    %222 = arith.addf %219, %221 : vector<16x32xf32>
    %c0_73 = arith.constant 0 : index
    %c0_74 = arith.constant 0 : index
    %c0_75 = arith.constant 0 : index
    %223 = vector.load %arg7[%c0_73, %c0_74, %c0_75] : memref<2x32x64xf32, #tpu.memory_space<vmem>>, vector<1x32x64xf32>
    %224 = vector.shape_cast %223 : vector<1x32x64xf32> to vector<32x64xf32>
    %cst_76 = arith.constant dense<0.000000e+00> : vector<16x64xf32>
    %225 = tpu.matmul %222, %224, %cst_76 {dimension_numbers = #tpu.dot_dimension_numbers<[1], [0], [0], [1], [0, 0, 1, 1], [], []>} : vector<16x32xf32>, vector<32x64xf32>, vector<16x64xf32> -> vector<16x64xf32>
    %c0_77 = arith.constant 0 : index
    %c0_78 = arith.constant 0 : index
    %226 = vector.load %arg8[%c0_77, %c0_78] : memref<2x64xf32, #tpu.memory_space<vmem>>, vector<1x64xf32>
    %227 = vector.shape_cast %226 : vector<1x64xf32> to vector<64xf32>
    %228 = vector.shape_cast %227 : vector<64xf32> to vector<1x64xf32>
    %229 = vector.broadcast %228 : vector<1x64xf32> to vector<16x64xf32>
    %230 = arith.addf %225, %229 : vector<16x64xf32>
    %cst_79 = arith.constant 0.000000e+00 : f32
    %231 = vector.broadcast %cst_79 : f32 to vector<16x64xf32>
    %232 = arith.maximumf %230, %231 : vector<16x64xf32>
    %c0_80 = arith.constant 0 : index
    %c0_81 = arith.constant 0 : index
    %c0_82 = arith.constant 0 : index
    %233 = vector.load %arg9[%c0_80, %c0_81, %c0_82] : memref<2x64x32xf32, #tpu.memory_space<vmem>>, vector<1x64x32xf32>
    %234 = vector.shape_cast %233 : vector<1x64x32xf32> to vector<64x32xf32>
    %cst_83 = arith.constant dense<0.000000e+00> : vector<16x32xf32>
    %235 = tpu.matmul %232, %234, %cst_83 {dimension_numbers = #tpu.dot_dimension_numbers<[1], [0], [0], [1], [0, 0, 1, 1], [], []>} : vector<16x64xf32>, vector<64x32xf32>, vector<16x32xf32> -> vector<16x32xf32>
    %236 = arith.addf %196, %235 : vector<16x32xf32>
    %c0_84 = arith.constant 0 : index
    %c0_85 = arith.constant 0 : index
    %237 = vector.load %arg10[%c0_84, %c0_85] : memref<2x32xf32, #tpu.memory_space<vmem>>, vector<1x32xf32>
    %238 = vector.shape_cast %237 : vector<1x32xf32> to vector<32xf32>
    %239 = vector.shape_cast %238 : vector<32xf32> to vector<1x32xf32>
    %240 = vector.broadcast %239 : vector<1x32xf32> to vector<16x32xf32>
    %241 = arith.addf %236, %240 : vector<16x32xf32>
    %c1_86 = arith.constant 1 : index
    %c0_87 = arith.constant 0 : index
    %c0_88 = arith.constant 0 : index
    %242 = vector.load %arg11[%c1_86, %c0_87, %c0_88] : memref<2x4x32xf32, #tpu.memory_space<vmem>>, vector<1x1x32xf32>
    %243 = vector.shape_cast %242 : vector<1x1x32xf32> to vector<32xf32>
    %c1_89 = arith.constant 1 : index
    %c1_90 = arith.constant 1 : index
    %c0_91 = arith.constant 0 : index
    %244 = vector.load %arg11[%c1_89, %c1_90, %c0_91] : memref<2x4x32xf32, #tpu.memory_space<vmem>>, vector<1x1x32xf32>
    %245 = vector.shape_cast %244 : vector<1x1x32xf32> to vector<32xf32>
    %cst_92 = arith.constant dense<0.000000e+00> : vector<16xf32>
    %246 = vector.multi_reduction <add>, %241, %cst_92 [1] : vector<16x32xf32> to vector<16xf32>
    %247 = vector.shape_cast %246 : vector<16xf32> to vector<16x1xf32>
    %cst_93 = arith.constant 3.200000e+01 : f32
    %248 = vector.broadcast %cst_93 : f32 to vector<16x1xf32>
    %249 = arith.divf %247, %248 : vector<16x1xf32>
    %250 = vector.broadcast %249 : vector<16x1xf32> to vector<16x32xf32>
    %251 = arith.subf %241, %250 : vector<16x32xf32>
    %252 = arith.mulf %251, %251 : vector<16x32xf32>
    %cst_94 = arith.constant dense<0.000000e+00> : vector<16xf32>
    %253 = vector.multi_reduction <add>, %252, %cst_94 [1] : vector<16x32xf32> to vector<16xf32>
    %254 = vector.shape_cast %253 : vector<16xf32> to vector<16x1xf32>
    %cst_95 = arith.constant 3.200000e+01 : f32
    %255 = vector.broadcast %cst_95 : f32 to vector<16x1xf32>
    %256 = arith.divf %254, %255 : vector<16x1xf32>
    %cst_96 = arith.constant 9.99999974E-6 : f32
    %257 = vector.broadcast %cst_96 : f32 to vector<16x1xf32>
    %258 = arith.addf %256, %257 : vector<16x1xf32>
    %259 = math.rsqrt %258 : vector<16x1xf32>
    %260 = vector.broadcast %259 : vector<16x1xf32> to vector<16x32xf32>
    %261 = arith.mulf %251, %260 : vector<16x32xf32>
    %262 = vector.shape_cast %243 : vector<32xf32> to vector<1x32xf32>
    %263 = vector.broadcast %262 : vector<1x32xf32> to vector<16x32xf32>
    %264 = arith.mulf %261, %263 : vector<16x32xf32>
    %265 = vector.shape_cast %245 : vector<32xf32> to vector<1x32xf32>
    %266 = vector.broadcast %265 : vector<1x32xf32> to vector<16x32xf32>
    %267 = arith.addf %264, %266 : vector<16x32xf32>
    %c1_97 = arith.constant 1 : index
    %c0_98 = arith.constant 0 : index
    %c0_99 = arith.constant 0 : index
    %268 = vector.load %arg3[%c1_97, %c0_98, %c0_99] : memref<2x32x96xf32, #tpu.memory_space<vmem>>, vector<1x32x96xf32>
    %269 = vector.shape_cast %268 : vector<1x32x96xf32> to vector<32x96xf32>
    %cst_100 = arith.constant dense<0.000000e+00> : vector<16x96xf32>
    %270 = tpu.matmul %267, %269, %cst_100 {dimension_numbers = #tpu.dot_dimension_numbers<[1], [0], [0], [1], [0, 0, 1, 1], [], []>} : vector<16x32xf32>, vector<32x96xf32>, vector<16x96xf32> -> vector<16x96xf32>
    %c1_101 = arith.constant 1 : index
    %c0_102 = arith.constant 0 : index
    %271 = vector.load %arg4[%c1_101, %c0_102] : memref<2x96xf32, #tpu.memory_space<vmem>>, vector<1x96xf32>
    %272 = vector.shape_cast %271 : vector<1x96xf32> to vector<96xf32>
    %273 = vector.shape_cast %272 : vector<96xf32> to vector<1x96xf32>
    %274 = vector.broadcast %273 : vector<1x96xf32> to vector<16x96xf32>
    %275 = arith.addf %270, %274 : vector<16x96xf32>
    %276 = vector.extract_strided_slice %275 {offsets = [0, 0], sizes = [16, 32], strides = [1, 1]} : vector<16x96xf32> to vector<16x32xf32>
    %277 = vector.extract_strided_slice %275 {offsets = [0, 32], sizes = [16, 32], strides = [1, 1]} : vector<16x96xf32> to vector<16x32xf32>
    %278 = vector.extract_strided_slice %275 {offsets = [0, 64], sizes = [16, 32], strides = [1, 1]} : vector<16x96xf32> to vector<16x32xf32>
    %279 = vector.extract_strided_slice %276 {offsets = [0, 0], sizes = [8, 32], strides = [1, 1]} : vector<16x32xf32> to vector<8x32xf32>
    %280 = vector.extract_strided_slice %277 {offsets = [0, 0], sizes = [8, 32], strides = [1, 1]} : vector<16x32xf32> to vector<8x32xf32>
    %281 = vector.extract_strided_slice %278 {offsets = [0, 0], sizes = [8, 32], strides = [1, 1]} : vector<16x32xf32> to vector<8x32xf32>
    %282 = vector.extract_strided_slice %279 {offsets = [0, 0], sizes = [8, 8], strides = [1, 1]} : vector<8x32xf32> to vector<8x8xf32>
    %283 = vector.extract_strided_slice %280 {offsets = [0, 0], sizes = [8, 8], strides = [1, 1]} : vector<8x32xf32> to vector<8x8xf32>
    %cst_103 = arith.constant dense<0.000000e+00> : vector<8x8xf32>
    %284 = tpu.matmul %282, %283, %cst_103 {dimension_numbers = #tpu.dot_dimension_numbers<[1], [1], [0], [0], [0, 0, 1, 0], [], []>} : vector<8x8xf32>, vector<8x8xf32>, vector<8x8xf32> -> vector<8x8xf32>
    %cst_104 = arith.constant -1.000000e+30 : f32
    %285 = vector.broadcast %cst_104 : f32 to vector<8x8xf32>
    %286 = arith.select %5, %284, %285 : vector<8x8xi1>, vector<8x8xf32>
    %cst_105 = arith.constant dense<0xFF800000> : vector<8xf32>
    %287 = vector.multi_reduction <maximumf>, %286, %cst_105 [1] : vector<8x8xf32> to vector<8xf32>
    %288 = vector.shape_cast %287 : vector<8xf32> to vector<8x1xf32>
    %289 = vector.broadcast %288 : vector<8x1xf32> to vector<8x8xf32>
    %290 = arith.subf %286, %289 : vector<8x8xf32>
    %291 = math.exp %290 : vector<8x8xf32>
    %cst_106 = arith.constant dense<0.000000e+00> : vector<8xf32>
    %292 = vector.multi_reduction <add>, %291, %cst_106 [1] : vector<8x8xf32> to vector<8xf32>
    %293 = vector.shape_cast %292 : vector<8xf32> to vector<8x1xf32>
    %294 = tpu.reciprocal %293 {approx = true} : vector<8x1xf32> -> vector<8x1xf32>
    %295 = vector.broadcast %294 : vector<8x1xf32> to vector<8x8xf32>
    %296 = arith.mulf %291, %295 : vector<8x8xf32>
    %297 = vector.extract_strided_slice %281 {offsets = [0, 0], sizes = [8, 8], strides = [1, 1]} : vector<8x32xf32> to vector<8x8xf32>
    %cst_107 = arith.constant dense<0.000000e+00> : vector<8x8xf32>
    %298 = tpu.matmul %296, %297, %cst_107 {dimension_numbers = #tpu.dot_dimension_numbers<[1], [0], [0], [1], [0, 0, 1, 1], [], []>} : vector<8x8xf32>, vector<8x8xf32>, vector<8x8xf32> -> vector<8x8xf32>
    %299 = vector.extract_strided_slice %279 {offsets = [0, 8], sizes = [8, 8], strides = [1, 1]} : vector<8x32xf32> to vector<8x8xf32>
    %300 = vector.extract_strided_slice %280 {offsets = [0, 8], sizes = [8, 8], strides = [1, 1]} : vector<8x32xf32> to vector<8x8xf32>
    %cst_108 = arith.constant dense<0.000000e+00> : vector<8x8xf32>
    %301 = tpu.matmul %299, %300, %cst_108 {dimension_numbers = #tpu.dot_dimension_numbers<[1], [1], [0], [0], [0, 0, 1, 0], [], []>} : vector<8x8xf32>, vector<8x8xf32>, vector<8x8xf32> -> vector<8x8xf32>
    %cst_109 = arith.constant -1.000000e+30 : f32
    %302 = vector.broadcast %cst_109 : f32 to vector<8x8xf32>
    %303 = arith.select %5, %301, %302 : vector<8x8xi1>, vector<8x8xf32>
    %cst_110 = arith.constant dense<0xFF800000> : vector<8xf32>
    %304 = vector.multi_reduction <maximumf>, %303, %cst_110 [1] : vector<8x8xf32> to vector<8xf32>
    %305 = vector.shape_cast %304 : vector<8xf32> to vector<8x1xf32>
    %306 = vector.broadcast %305 : vector<8x1xf32> to vector<8x8xf32>
    %307 = arith.subf %303, %306 : vector<8x8xf32>
    %308 = math.exp %307 : vector<8x8xf32>
    %cst_111 = arith.constant dense<0.000000e+00> : vector<8xf32>
    %309 = vector.multi_reduction <add>, %308, %cst_111 [1] : vector<8x8xf32> to vector<8xf32>
    %310 = vector.shape_cast %309 : vector<8xf32> to vector<8x1xf32>
    %311 = tpu.reciprocal %310 {approx = true} : vector<8x1xf32> -> vector<8x1xf32>
    %312 = vector.broadcast %311 : vector<8x1xf32> to vector<8x8xf32>
    %313 = arith.mulf %308, %312 : vector<8x8xf32>
    %314 = vector.extract_strided_slice %281 {offsets = [0, 8], sizes = [8, 8], strides = [1, 1]} : vector<8x32xf32> to vector<8x8xf32>
    %cst_112 = arith.constant dense<0.000000e+00> : vector<8x8xf32>
    %315 = tpu.matmul %313, %314, %cst_112 {dimension_numbers = #tpu.dot_dimension_numbers<[1], [0], [0], [1], [0, 0, 1, 1], [], []>} : vector<8x8xf32>, vector<8x8xf32>, vector<8x8xf32> -> vector<8x8xf32>
    %316 = vector.extract_strided_slice %279 {offsets = [0, 16], sizes = [8, 8], strides = [1, 1]} : vector<8x32xf32> to vector<8x8xf32>
    %317 = vector.extract_strided_slice %280 {offsets = [0, 16], sizes = [8, 8], strides = [1, 1]} : vector<8x32xf32> to vector<8x8xf32>
    %cst_113 = arith.constant dense<0.000000e+00> : vector<8x8xf32>
    %318 = tpu.matmul %316, %317, %cst_113 {dimension_numbers = #tpu.dot_dimension_numbers<[1], [1], [0], [0], [0, 0, 1, 0], [], []>} : vector<8x8xf32>, vector<8x8xf32>, vector<8x8xf32> -> vector<8x8xf32>
    %cst_114 = arith.constant -1.000000e+30 : f32
    %319 = vector.broadcast %cst_114 : f32 to vector<8x8xf32>
    %320 = arith.select %5, %318, %319 : vector<8x8xi1>, vector<8x8xf32>
    %cst_115 = arith.constant dense<0xFF800000> : vector<8xf32>
    %321 = vector.multi_reduction <maximumf>, %320, %cst_115 [1] : vector<8x8xf32> to vector<8xf32>
    %322 = vector.shape_cast %321 : vector<8xf32> to vector<8x1xf32>
    %323 = vector.broadcast %322 : vector<8x1xf32> to vector<8x8xf32>
    %324 = arith.subf %320, %323 : vector<8x8xf32>
    %325 = math.exp %324 : vector<8x8xf32>
    %cst_116 = arith.constant dense<0.000000e+00> : vector<8xf32>
    %326 = vector.multi_reduction <add>, %325, %cst_116 [1] : vector<8x8xf32> to vector<8xf32>
    %327 = vector.shape_cast %326 : vector<8xf32> to vector<8x1xf32>
    %328 = tpu.reciprocal %327 {approx = true} : vector<8x1xf32> -> vector<8x1xf32>
    %329 = vector.broadcast %328 : vector<8x1xf32> to vector<8x8xf32>
    %330 = arith.mulf %325, %329 : vector<8x8xf32>
    %331 = vector.extract_strided_slice %281 {offsets = [0, 16], sizes = [8, 8], strides = [1, 1]} : vector<8x32xf32> to vector<8x8xf32>
    %cst_117 = arith.constant dense<0.000000e+00> : vector<8x8xf32>
    %332 = tpu.matmul %330, %331, %cst_117 {dimension_numbers = #tpu.dot_dimension_numbers<[1], [0], [0], [1], [0, 0, 1, 1], [], []>} : vector<8x8xf32>, vector<8x8xf32>, vector<8x8xf32> -> vector<8x8xf32>
    %333 = vector.extract_strided_slice %279 {offsets = [0, 24], sizes = [8, 8], strides = [1, 1]} : vector<8x32xf32> to vector<8x8xf32>
    %334 = vector.extract_strided_slice %280 {offsets = [0, 24], sizes = [8, 8], strides = [1, 1]} : vector<8x32xf32> to vector<8x8xf32>
    %cst_118 = arith.constant dense<0.000000e+00> : vector<8x8xf32>
    %335 = tpu.matmul %333, %334, %cst_118 {dimension_numbers = #tpu.dot_dimension_numbers<[1], [1], [0], [0], [0, 0, 1, 0], [], []>} : vector<8x8xf32>, vector<8x8xf32>, vector<8x8xf32> -> vector<8x8xf32>
    %cst_119 = arith.constant -1.000000e+30 : f32
    %336 = vector.broadcast %cst_119 : f32 to vector<8x8xf32>
    %337 = arith.select %5, %335, %336 : vector<8x8xi1>, vector<8x8xf32>
    %cst_120 = arith.constant dense<0xFF800000> : vector<8xf32>
    %338 = vector.multi_reduction <maximumf>, %337, %cst_120 [1] : vector<8x8xf32> to vector<8xf32>
    %339 = vector.shape_cast %338 : vector<8xf32> to vector<8x1xf32>
    %340 = vector.broadcast %339 : vector<8x1xf32> to vector<8x8xf32>
    %341 = arith.subf %337, %340 : vector<8x8xf32>
    %342 = math.exp %341 : vector<8x8xf32>
    %cst_121 = arith.constant dense<0.000000e+00> : vector<8xf32>
    %343 = vector.multi_reduction <add>, %342, %cst_121 [1] : vector<8x8xf32> to vector<8xf32>
    %344 = vector.shape_cast %343 : vector<8xf32> to vector<8x1xf32>
    %345 = tpu.reciprocal %344 {approx = true} : vector<8x1xf32> -> vector<8x1xf32>
    %346 = vector.broadcast %345 : vector<8x1xf32> to vector<8x8xf32>
    %347 = arith.mulf %342, %346 : vector<8x8xf32>
    %348 = vector.extract_strided_slice %281 {offsets = [0, 24], sizes = [8, 8], strides = [1, 1]} : vector<8x32xf32> to vector<8x8xf32>
    %cst_122 = arith.constant dense<0.000000e+00> : vector<8x8xf32>
    %349 = tpu.matmul %347, %348, %cst_122 {dimension_numbers = #tpu.dot_dimension_numbers<[1], [0], [0], [1], [0, 0, 1, 1], [], []>} : vector<8x8xf32>, vector<8x8xf32>, vector<8x8xf32> -> vector<8x8xf32>
    %350 = tpu.concatenate %298, %315, %332, %349 in 1 : vector<8x8xf32>, vector<8x8xf32>, vector<8x8xf32>, vector<8x8xf32> -> vector<8x32xf32>
    %351 = vector.extract_strided_slice %276 {offsets = [8, 0], sizes = [8, 32], strides = [1, 1]} : vector<16x32xf32> to vector<8x32xf32>
    %352 = vector.extract_strided_slice %277 {offsets = [8, 0], sizes = [8, 32], strides = [1, 1]} : vector<16x32xf32> to vector<8x32xf32>
    %353 = vector.extract_strided_slice %278 {offsets = [8, 0], sizes = [8, 32], strides = [1, 1]} : vector<16x32xf32> to vector<8x32xf32>
    %354 = vector.extract_strided_slice %351 {offsets = [0, 0], sizes = [8, 8], strides = [1, 1]} : vector<8x32xf32> to vector<8x8xf32>
    %355 = vector.extract_strided_slice %352 {offsets = [0, 0], sizes = [8, 8], strides = [1, 1]} : vector<8x32xf32> to vector<8x8xf32>
    %cst_123 = arith.constant dense<0.000000e+00> : vector<8x8xf32>
    %356 = tpu.matmul %354, %355, %cst_123 {dimension_numbers = #tpu.dot_dimension_numbers<[1], [1], [0], [0], [0, 0, 1, 0], [], []>} : vector<8x8xf32>, vector<8x8xf32>, vector<8x8xf32> -> vector<8x8xf32>
    %cst_124 = arith.constant -1.000000e+30 : f32
    %357 = vector.broadcast %cst_124 : f32 to vector<8x8xf32>
    %358 = arith.select %5, %356, %357 : vector<8x8xi1>, vector<8x8xf32>
    %cst_125 = arith.constant dense<0xFF800000> : vector<8xf32>
    %359 = vector.multi_reduction <maximumf>, %358, %cst_125 [1] : vector<8x8xf32> to vector<8xf32>
    %360 = vector.shape_cast %359 : vector<8xf32> to vector<8x1xf32>
    %361 = vector.broadcast %360 : vector<8x1xf32> to vector<8x8xf32>
    %362 = arith.subf %358, %361 : vector<8x8xf32>
    %363 = math.exp %362 : vector<8x8xf32>
    %cst_126 = arith.constant dense<0.000000e+00> : vector<8xf32>
    %364 = vector.multi_reduction <add>, %363, %cst_126 [1] : vector<8x8xf32> to vector<8xf32>
    %365 = vector.shape_cast %364 : vector<8xf32> to vector<8x1xf32>
    %366 = tpu.reciprocal %365 {approx = true} : vector<8x1xf32> -> vector<8x1xf32>
    %367 = vector.broadcast %366 : vector<8x1xf32> to vector<8x8xf32>
    %368 = arith.mulf %363, %367 : vector<8x8xf32>
    %369 = vector.extract_strided_slice %353 {offsets = [0, 0], sizes = [8, 8], strides = [1, 1]} : vector<8x32xf32> to vector<8x8xf32>
    %cst_127 = arith.constant dense<0.000000e+00> : vector<8x8xf32>
    %370 = tpu.matmul %368, %369, %cst_127 {dimension_numbers = #tpu.dot_dimension_numbers<[1], [0], [0], [1], [0, 0, 1, 1], [], []>} : vector<8x8xf32>, vector<8x8xf32>, vector<8x8xf32> -> vector<8x8xf32>
    %371 = vector.extract_strided_slice %351 {offsets = [0, 8], sizes = [8, 8], strides = [1, 1]} : vector<8x32xf32> to vector<8x8xf32>
    %372 = vector.extract_strided_slice %352 {offsets = [0, 8], sizes = [8, 8], strides = [1, 1]} : vector<8x32xf32> to vector<8x8xf32>
    %cst_128 = arith.constant dense<0.000000e+00> : vector<8x8xf32>
    %373 = tpu.matmul %371, %372, %cst_128 {dimension_numbers = #tpu.dot_dimension_numbers<[1], [1], [0], [0], [0, 0, 1, 0], [], []>} : vector<8x8xf32>, vector<8x8xf32>, vector<8x8xf32> -> vector<8x8xf32>
    %cst_129 = arith.constant -1.000000e+30 : f32
    %374 = vector.broadcast %cst_129 : f32 to vector<8x8xf32>
    %375 = arith.select %5, %373, %374 : vector<8x8xi1>, vector<8x8xf32>
    %cst_130 = arith.constant dense<0xFF800000> : vector<8xf32>
    %376 = vector.multi_reduction <maximumf>, %375, %cst_130 [1] : vector<8x8xf32> to vector<8xf32>
    %377 = vector.shape_cast %376 : vector<8xf32> to vector<8x1xf32>
    %378 = vector.broadcast %377 : vector<8x1xf32> to vector<8x8xf32>
    %379 = arith.subf %375, %378 : vector<8x8xf32>
    %380 = math.exp %379 : vector<8x8xf32>
    %cst_131 = arith.constant dense<0.000000e+00> : vector<8xf32>
    %381 = vector.multi_reduction <add>, %380, %cst_131 [1] : vector<8x8xf32> to vector<8xf32>
    %382 = vector.shape_cast %381 : vector<8xf32> to vector<8x1xf32>
    %383 = tpu.reciprocal %382 {approx = true} : vector<8x1xf32> -> vector<8x1xf32>
    %384 = vector.broadcast %383 : vector<8x1xf32> to vector<8x8xf32>
    %385 = arith.mulf %380, %384 : vector<8x8xf32>
    %386 = vector.extract_strided_slice %353 {offsets = [0, 8], sizes = [8, 8], strides = [1, 1]} : vector<8x32xf32> to vector<8x8xf32>
    %cst_132 = arith.constant dense<0.000000e+00> : vector<8x8xf32>
    %387 = tpu.matmul %385, %386, %cst_132 {dimension_numbers = #tpu.dot_dimension_numbers<[1], [0], [0], [1], [0, 0, 1, 1], [], []>} : vector<8x8xf32>, vector<8x8xf32>, vector<8x8xf32> -> vector<8x8xf32>
    %388 = vector.extract_strided_slice %351 {offsets = [0, 16], sizes = [8, 8], strides = [1, 1]} : vector<8x32xf32> to vector<8x8xf32>
    %389 = vector.extract_strided_slice %352 {offsets = [0, 16], sizes = [8, 8], strides = [1, 1]} : vector<8x32xf32> to vector<8x8xf32>
    %cst_133 = arith.constant dense<0.000000e+00> : vector<8x8xf32>
    %390 = tpu.matmul %388, %389, %cst_133 {dimension_numbers = #tpu.dot_dimension_numbers<[1], [1], [0], [0], [0, 0, 1, 0], [], []>} : vector<8x8xf32>, vector<8x8xf32>, vector<8x8xf32> -> vector<8x8xf32>
    %cst_134 = arith.constant -1.000000e+30 : f32
    %391 = vector.broadcast %cst_134 : f32 to vector<8x8xf32>
    %392 = arith.select %5, %390, %391 : vector<8x8xi1>, vector<8x8xf32>
    %cst_135 = arith.constant dense<0xFF800000> : vector<8xf32>
    %393 = vector.multi_reduction <maximumf>, %392, %cst_135 [1] : vector<8x8xf32> to vector<8xf32>
    %394 = vector.shape_cast %393 : vector<8xf32> to vector<8x1xf32>
    %395 = vector.broadcast %394 : vector<8x1xf32> to vector<8x8xf32>
    %396 = arith.subf %392, %395 : vector<8x8xf32>
    %397 = math.exp %396 : vector<8x8xf32>
    %cst_136 = arith.constant dense<0.000000e+00> : vector<8xf32>
    %398 = vector.multi_reduction <add>, %397, %cst_136 [1] : vector<8x8xf32> to vector<8xf32>
    %399 = vector.shape_cast %398 : vector<8xf32> to vector<8x1xf32>
    %400 = tpu.reciprocal %399 {approx = true} : vector<8x1xf32> -> vector<8x1xf32>
    %401 = vector.broadcast %400 : vector<8x1xf32> to vector<8x8xf32>
    %402 = arith.mulf %397, %401 : vector<8x8xf32>
    %403 = vector.extract_strided_slice %353 {offsets = [0, 16], sizes = [8, 8], strides = [1, 1]} : vector<8x32xf32> to vector<8x8xf32>
    %cst_137 = arith.constant dense<0.000000e+00> : vector<8x8xf32>
    %404 = tpu.matmul %402, %403, %cst_137 {dimension_numbers = #tpu.dot_dimension_numbers<[1], [0], [0], [1], [0, 0, 1, 1], [], []>} : vector<8x8xf32>, vector<8x8xf32>, vector<8x8xf32> -> vector<8x8xf32>
    %405 = vector.extract_strided_slice %351 {offsets = [0, 24], sizes = [8, 8], strides = [1, 1]} : vector<8x32xf32> to vector<8x8xf32>
    %406 = vector.extract_strided_slice %352 {offsets = [0, 24], sizes = [8, 8], strides = [1, 1]} : vector<8x32xf32> to vector<8x8xf32>
    %cst_138 = arith.constant dense<0.000000e+00> : vector<8x8xf32>
    %407 = tpu.matmul %405, %406, %cst_138 {dimension_numbers = #tpu.dot_dimension_numbers<[1], [1], [0], [0], [0, 0, 1, 0], [], []>} : vector<8x8xf32>, vector<8x8xf32>, vector<8x8xf32> -> vector<8x8xf32>
    %cst_139 = arith.constant -1.000000e+30 : f32
    %408 = vector.broadcast %cst_139 : f32 to vector<8x8xf32>
    %409 = arith.select %5, %407, %408 : vector<8x8xi1>, vector<8x8xf32>
    %cst_140 = arith.constant dense<0xFF800000> : vector<8xf32>
    %410 = vector.multi_reduction <maximumf>, %409, %cst_140 [1] : vector<8x8xf32> to vector<8xf32>
    %411 = vector.shape_cast %410 : vector<8xf32> to vector<8x1xf32>
    %412 = vector.broadcast %411 : vector<8x1xf32> to vector<8x8xf32>
    %413 = arith.subf %409, %412 : vector<8x8xf32>
    %414 = math.exp %413 : vector<8x8xf32>
    %cst_141 = arith.constant dense<0.000000e+00> : vector<8xf32>
    %415 = vector.multi_reduction <add>, %414, %cst_141 [1] : vector<8x8xf32> to vector<8xf32>
    %416 = vector.shape_cast %415 : vector<8xf32> to vector<8x1xf32>
    %417 = tpu.reciprocal %416 {approx = true} : vector<8x1xf32> -> vector<8x1xf32>
    %418 = vector.broadcast %417 : vector<8x1xf32> to vector<8x8xf32>
    %419 = arith.mulf %414, %418 : vector<8x8xf32>
    %420 = vector.extract_strided_slice %353 {offsets = [0, 24], sizes = [8, 8], strides = [1, 1]} : vector<8x32xf32> to vector<8x8xf32>
    %cst_142 = arith.constant dense<0.000000e+00> : vector<8x8xf32>
    %421 = tpu.matmul %419, %420, %cst_142 {dimension_numbers = #tpu.dot_dimension_numbers<[1], [0], [0], [1], [0, 0, 1, 1], [], []>} : vector<8x8xf32>, vector<8x8xf32>, vector<8x8xf32> -> vector<8x8xf32>
    %422 = tpu.concatenate %370, %387, %404, %421 in 1 : vector<8x8xf32>, vector<8x8xf32>, vector<8x8xf32>, vector<8x8xf32> -> vector<8x32xf32>
    %423 = tpu.concatenate %350, %422 in 0 : vector<8x32xf32>, vector<8x32xf32> -> vector<16x32xf32>
    %c1_143 = arith.constant 1 : index
    %c0_144 = arith.constant 0 : index
    %c0_145 = arith.constant 0 : index
    %424 = vector.load %arg5[%c1_143, %c0_144, %c0_145] : memref<2x32x32xf32, #tpu.memory_space<vmem>>, vector<1x32x32xf32>
    %425 = vector.shape_cast %424 : vector<1x32x32xf32> to vector<32x32xf32>
    %cst_146 = arith.constant dense<0.000000e+00> : vector<16x32xf32>
    %426 = tpu.matmul %423, %425, %cst_146 {dimension_numbers = #tpu.dot_dimension_numbers<[1], [0], [0], [1], [0, 0, 1, 1], [], []>} : vector<16x32xf32>, vector<32x32xf32>, vector<16x32xf32> -> vector<16x32xf32>
    %427 = arith.addf %241, %426 : vector<16x32xf32>
    %c1_147 = arith.constant 1 : index
    %c0_148 = arith.constant 0 : index
    %428 = vector.load %arg6[%c1_147, %c0_148] : memref<2x32xf32, #tpu.memory_space<vmem>>, vector<1x32xf32>
    %429 = vector.shape_cast %428 : vector<1x32xf32> to vector<32xf32>
    %430 = vector.shape_cast %429 : vector<32xf32> to vector<1x32xf32>
    %431 = vector.broadcast %430 : vector<1x32xf32> to vector<16x32xf32>
    %432 = arith.addf %427, %431 : vector<16x32xf32>
    %c1_149 = arith.constant 1 : index
    %c2_150 = arith.constant 2 : index
    %c0_151 = arith.constant 0 : index
    %433 = vector.load %arg11[%c1_149, %c2_150, %c0_151] : memref<2x4x32xf32, #tpu.memory_space<vmem>>, vector<1x1x32xf32>
    %434 = vector.shape_cast %433 : vector<1x1x32xf32> to vector<32xf32>
    %c1_152 = arith.constant 1 : index
    %c3_153 = arith.constant 3 : index
    %c0_154 = arith.constant 0 : index
    %435 = vector.load %arg11[%c1_152, %c3_153, %c0_154] : memref<2x4x32xf32, #tpu.memory_space<vmem>>, vector<1x1x32xf32>
    %436 = vector.shape_cast %435 : vector<1x1x32xf32> to vector<32xf32>
    %cst_155 = arith.constant dense<0.000000e+00> : vector<16xf32>
    %437 = vector.multi_reduction <add>, %432, %cst_155 [1] : vector<16x32xf32> to vector<16xf32>
    %438 = vector.shape_cast %437 : vector<16xf32> to vector<16x1xf32>
    %cst_156 = arith.constant 3.200000e+01 : f32
    %439 = vector.broadcast %cst_156 : f32 to vector<16x1xf32>
    %440 = arith.divf %438, %439 : vector<16x1xf32>
    %441 = vector.broadcast %440 : vector<16x1xf32> to vector<16x32xf32>
    %442 = arith.subf %432, %441 : vector<16x32xf32>
    %443 = arith.mulf %442, %442 : vector<16x32xf32>
    %cst_157 = arith.constant dense<0.000000e+00> : vector<16xf32>
    %444 = vector.multi_reduction <add>, %443, %cst_157 [1] : vector<16x32xf32> to vector<16xf32>
    %445 = vector.shape_cast %444 : vector<16xf32> to vector<16x1xf32>
    %cst_158 = arith.constant 3.200000e+01 : f32
    %446 = vector.broadcast %cst_158 : f32 to vector<16x1xf32>
    %447 = arith.divf %445, %446 : vector<16x1xf32>
    %cst_159 = arith.constant 9.99999974E-6 : f32
    %448 = vector.broadcast %cst_159 : f32 to vector<16x1xf32>
    %449 = arith.addf %447, %448 : vector<16x1xf32>
    %450 = math.rsqrt %449 : vector<16x1xf32>
    %451 = vector.broadcast %450 : vector<16x1xf32> to vector<16x32xf32>
    %452 = arith.mulf %442, %451 : vector<16x32xf32>
    %453 = vector.shape_cast %434 : vector<32xf32> to vector<1x32xf32>
    %454 = vector.broadcast %453 : vector<1x32xf32> to vector<16x32xf32>
    %455 = arith.mulf %452, %454 : vector<16x32xf32>
    %456 = vector.shape_cast %436 : vector<32xf32> to vector<1x32xf32>
    %457 = vector.broadcast %456 : vector<1x32xf32> to vector<16x32xf32>
    %458 = arith.addf %455, %457 : vector<16x32xf32>
    %c1_160 = arith.constant 1 : index
    %c0_161 = arith.constant 0 : index
    %c0_162 = arith.constant 0 : index
    %459 = vector.load %arg7[%c1_160, %c0_161, %c0_162] : memref<2x32x64xf32, #tpu.memory_space<vmem>>, vector<1x32x64xf32>
    %460 = vector.shape_cast %459 : vector<1x32x64xf32> to vector<32x64xf32>
    %cst_163 = arith.constant dense<0.000000e+00> : vector<16x64xf32>
    %461 = tpu.matmul %458, %460, %cst_163 {dimension_numbers = #tpu.dot_dimension_numbers<[1], [0], [0], [1], [0, 0, 1, 1], [], []>} : vector<16x32xf32>, vector<32x64xf32>, vector<16x64xf32> -> vector<16x64xf32>
    %c1_164 = arith.constant 1 : index
    %c0_165 = arith.constant 0 : index
    %462 = vector.load %arg8[%c1_164, %c0_165] : memref<2x64xf32, #tpu.memory_space<vmem>>, vector<1x64xf32>
    %463 = vector.shape_cast %462 : vector<1x64xf32> to vector<64xf32>
    %464 = vector.shape_cast %463 : vector<64xf32> to vector<1x64xf32>
    %465 = vector.broadcast %464 : vector<1x64xf32> to vector<16x64xf32>
    %466 = arith.addf %461, %465 : vector<16x64xf32>
    %cst_166 = arith.constant 0.000000e+00 : f32
    %467 = vector.broadcast %cst_166 : f32 to vector<16x64xf32>
    %468 = arith.maximumf %466, %467 : vector<16x64xf32>
    %c1_167 = arith.constant 1 : index
    %c0_168 = arith.constant 0 : index
    %c0_169 = arith.constant 0 : index
    %469 = vector.load %arg9[%c1_167, %c0_168, %c0_169] : memref<2x64x32xf32, #tpu.memory_space<vmem>>, vector<1x64x32xf32>
    %470 = vector.shape_cast %469 : vector<1x64x32xf32> to vector<64x32xf32>
    %cst_170 = arith.constant dense<0.000000e+00> : vector<16x32xf32>
    %471 = tpu.matmul %468, %470, %cst_170 {dimension_numbers = #tpu.dot_dimension_numbers<[1], [0], [0], [1], [0, 0, 1, 1], [], []>} : vector<16x64xf32>, vector<64x32xf32>, vector<16x32xf32> -> vector<16x32xf32>
    %472 = arith.addf %432, %471 : vector<16x32xf32>
    %c1_171 = arith.constant 1 : index
    %c0_172 = arith.constant 0 : index
    %473 = vector.load %arg10[%c1_171, %c0_172] : memref<2x32xf32, #tpu.memory_space<vmem>>, vector<1x32xf32>
    %474 = vector.shape_cast %473 : vector<1x32xf32> to vector<32xf32>
    %475 = vector.shape_cast %474 : vector<32xf32> to vector<1x32xf32>
    %476 = vector.broadcast %475 : vector<1x32xf32> to vector<16x32xf32>
    %477 = arith.addf %472, %476 : vector<16x32xf32>
    %c0_173 = arith.constant 0 : index
    %c0_174 = arith.constant 0 : index
    %478 = vector.load %arg12[%c0_173, %c0_174] : memref<2x32xf32, #tpu.memory_space<vmem>>, vector<1x32xf32>
    %479 = vector.shape_cast %478 : vector<1x32xf32> to vector<32xf32>
    %c1_175 = arith.constant 1 : index
    %c0_176 = arith.constant 0 : index
    %480 = vector.load %arg12[%c1_175, %c0_176] : memref<2x32xf32, #tpu.memory_space<vmem>>, vector<1x32xf32>
    %481 = vector.shape_cast %480 : vector<1x32xf32> to vector<32xf32>
    %cst_177 = arith.constant dense<0.000000e+00> : vector<16xf32>
    %482 = vector.multi_reduction <add>, %477, %cst_177 [1] : vector<16x32xf32> to vector<16xf32>
    %483 = vector.shape_cast %482 : vector<16xf32> to vector<16x1xf32>
    %cst_178 = arith.constant 3.200000e+01 : f32
    %484 = vector.broadcast %cst_178 : f32 to vector<16x1xf32>
    %485 = arith.divf %483, %484 : vector<16x1xf32>
    %486 = vector.broadcast %485 : vector<16x1xf32> to vector<16x32xf32>
    %487 = arith.subf %477, %486 : vector<16x32xf32>
    %488 = arith.mulf %487, %487 : vector<16x32xf32>
    %cst_179 = arith.constant dense<0.000000e+00> : vector<16xf32>
    %489 = vector.multi_reduction <add>, %488, %cst_179 [1] : vector<16x32xf32> to vector<16xf32>
    %490 = vector.shape_cast %489 : vector<16xf32> to vector<16x1xf32>
    %cst_180 = arith.constant 3.200000e+01 : f32
    %491 = vector.broadcast %cst_180 : f32 to vector<16x1xf32>
    %492 = arith.divf %490, %491 : vector<16x1xf32>
    %cst_181 = arith.constant 9.99999974E-6 : f32
    %493 = vector.broadcast %cst_181 : f32 to vector<16x1xf32>
    %494 = arith.addf %492, %493 : vector<16x1xf32>
    %495 = math.rsqrt %494 : vector<16x1xf32>
    %496 = vector.broadcast %495 : vector<16x1xf32> to vector<16x32xf32>
    %497 = arith.mulf %487, %496 : vector<16x32xf32>
    %498 = vector.shape_cast %479 : vector<32xf32> to vector<1x32xf32>
    %499 = vector.broadcast %498 : vector<1x32xf32> to vector<16x32xf32>
    %500 = arith.mulf %497, %499 : vector<16x32xf32>
    %501 = vector.shape_cast %481 : vector<32xf32> to vector<1x32xf32>
    %502 = vector.broadcast %501 : vector<1x32xf32> to vector<16x32xf32>
    %503 = arith.addf %500, %502 : vector<16x32xf32>
    %c0_182 = arith.constant 0 : index
    %c0_183 = arith.constant 0 : index
    %504 = vector.load %arg13[%c0_182, %c0_183] : memref<16x32xf32, #tpu.memory_space<vmem>>, vector<16x32xf32>
    tpu.vector_store %arg13[%c0_182, %c0_183], %503 {strides = array<i32>} : memref<16x32xf32, #tpu.memory_space<vmem>>, vector<16x32xf32>,
    return
  }
  func.func @transform_0(%arg0: i32) -> (i32, i32) {
    %c0_i32 = arith.constant 0 : i32
    %c0_i32_0 = arith.constant 0 : i32
    %c0_i32_1 = arith.constant 0 : i32
    return %c0_i32, %c0_i32_0 : i32, i32
  }
  func.func @transform_1(%arg0: i32) -> (i32, i32) {
    %c0_i32 = arith.constant 0 : i32
    %c0_i32_0 = arith.constant 0 : i32
    %c0_i32_1 = arith.constant 0 : i32
    return %c0_i32, %c0_i32_0 : i32, i32
  }
  func.func @transform_2(%arg0: i32) -> (i32, i32, i32) {
    %c0_i32 = arith.constant 0 : i32
    %c0_i32_0 = arith.constant 0 : i32
    %c0_i32_1 = arith.constant 0 : i32
    %c0_i32_2 = arith.constant 0 : i32
    return %c0_i32, %c0_i32_0, %c0_i32_1 : i32, i32, i32
  }
  func.func @transform_3(%arg0: i32) -> (i32, i32) {
    %c0_i32 = arith.constant 0 : i32
    %c0_i32_0 = arith.constant 0 : i32
    %c0_i32_1 = arith.constant 0 : i32
    return %c0_i32, %c0_i32_0 : i32, i32
  }
  func.func @transform_4(%arg0: i32) -> (i32, i32, i32) {
    %c0_i32 = arith.constant 0 : i32
    %c0_i32_0 = arith.constant 0 : i32
    %c0_i32_1 = arith.constant 0 : i32
    %c0_i32_2 = arith.constant 0 : i32
    return %c0_i32, %c0_i32_0, %c0_i32_1 : i32, i32, i32
  }
  func.func @transform_5(%arg0: i32) -> (i32, i32) {
    %c0_i32 = arith.constant 0 : i32
    %c0_i32_0 = arith.constant 0 : i32
    %c0_i32_1 = arith.constant 0 : i32
    return %c0_i32, %c0_i32_0 : i32, i32
  }
  func.func @transform_6(%arg0: i32) -> (i32, i32, i32) {
    %c0_i32 = arith.constant 0 : i32
    %c0_i32_0 = arith.constant 0 : i32
    %c0_i32_1 = arith.constant 0 : i32
    %c0_i32_2 = arith.constant 0 : i32
    return %c0_i32, %c0_i32_0, %c0_i32_1 : i32, i32, i32
  }
  func.func @transform_7(%arg0: i32) -> (i32, i32) {
    %c0_i32 = arith.constant 0 : i32
    %c0_i32_0 = arith.constant 0 : i32
    %c0_i32_1 = arith.constant 0 : i32
    return %c0_i32, %c0_i32_0 : i32, i32
  }
  func.func @transform_8(%arg0: i32) -> (i32, i32, i32) {
    %c0_i32 = arith.constant 0 : i32
    %c0_i32_0 = arith.constant 0 : i32
    %c0_i32_1 = arith.constant 0 : i32
    %c0_i32_2 = arith.constant 0 : i32
    return %c0_i32, %c0_i32_0, %c0_i32_1 : i32, i32, i32
  }
  func.func @transform_9(%arg0: i32) -> (i32, i32) {
    %c0_i32 = arith.constant 0 : i32
    %c0_i32_0 = arith.constant 0 : i32
    %c0_i32_1 = arith.constant 0 : i32
    return %c0_i32, %c0_i32_0 : i32, i32
  }
  func.func @transform_10(%arg0: i32) -> (i32, i32, i32) {
    %c0_i32 = arith.constant 0 : i32
    %c0_i32_0 = arith.constant 0 : i32
    %c0_i32_1 = arith.constant 0 : i32
    %c0_i32_2 = arith.constant 0 : i32
    return %c0_i32, %c0_i32_0, %c0_i32_1 : i32, i32, i32
  }
  func.func @transform_11(%arg0: i32) -> (i32, i32) {
    %c0_i32 = arith.constant 0 : i32
    %c0_i32_0 = arith.constant 0 : i32
    %c0_i32_1 = arith.constant 0 : i32
    return %c0_i32, %c0_i32_0 : i32, i32
  }
  func.func @transform_12(%arg0: i32) -> (i32, i32) {
    %c0_i32 = arith.constant 0 : i32
    %c0_i32_0 = arith.constant 0 : i32
    %c0_i32_1 = arith.constant 0 : i32
    return %c0_i32, %c0_i32_0 : i32, i32
  }
}

</mosaic_0001>

<bundles_post_ra>
// kernel: tpu_custom_call.1
= control target key start
LH: loop header
LB: loop body
LE: loop exit
PB: predicated region body
PF: predicated region fallthrough
CT: control target
= control target key end

     0   :  { %17 = vsyncpa [#allocation3], 0  ;;  %s2951_s0 = inlined_call_operand.hbm [shape: f32[16,32], index: 0, kind: input, shape index: {}]   ;;  %s2952_s1 = inlined_call_operand.hbm [shape: f32[16,32], index: 1, kind: input, shape index: {}]   ;;  %s2953_s2 = inlined_call_operand.vmem [shape: f32[2,32,96], index: 2, kind: input, shape index: {}]   ;;  %s2954_s3 = inlined_call_operand.hbm [shape: f32[2,96], index: 3, kind: input, shape index: {}]   ;;  %s2955_s4 = inlined_call_operand.vmem [shape: f32[2,32,32], index: 4, kind: input, shape index: {}]   ;;  %s2956_s5 = inlined_call_operand.hbm [shape: f32[2,32], index: 5, kind: input, shape index: {}]   ;;  %s2957_s6 = inlined_call_operand.vmem [shape: f32[2,32,64], index: 6, kind: input, shape index: {}]   ;;  %s2958_s7 = inlined_call_operand.hbm [shape: f32[2,64], index: 7, kind: input, shape index: {}]   ;;  %s2959_s8 = inlined_call_operand.vmem [shape: f32[2,64,32], index: 8, kind: input, shape index: {}]   ;;  %s2960_s9 = inlined_call_operand.hbm [shape: f32[2,32], index: 9, kind: input, shape index: {}]   ;;  %s2961_s10 = inlined_call_operand.vmem [shape: f32[2,4,32], index: 10, kind: input, shape index: {}]   ;;  %s2962_s11 = inlined_call_operand.hbm [shape: f32[2,32], index: 11, kind: input, shape index: {}]   ;;  %s2963_s12 = inlined_call_operand.hbm [shape: f32[16,32], index: 12, kind: output, shape index: {}]  }
   0x1   :  { %18 = vsyncpa [#allocation6], 0 }
   0x2   :  { %19 = vsyncpa [#allocation9], 0 }
   0x3   :  { %20 = vsyncpa [#allocation12], 0 }
   0x4   :  { %21 = vsyncpa [#allocation4], 0  ;;  %s39_s23 = sshll.u32 %s2952_s1, 4  ;;  %s2291_s24 = smov [#allocation5]   ;;  %s40_s23 = int_to_ptr.hbm [resolvable:$true] %s39_s23 }
   0x5   :  { %s41_s25 = sshll.u32 %s2291_s24, 4  ;;  %s68_s28 = sshll.u32 %s2956_s5, 4  ;;  %s42_s25 = int_to_ptr.vmem [resolvable:$true] %s41_s25  ;;  %s69_s28 = int_to_ptr.hbm [resolvable:$true] %s68_s28 }
   0x6   :  { %s2292_s29 = smov 128   ;;  %s2293_s30 = smov 8  }
   0x7   :  { %47 = dma.hbm_to_vmem [thread:$0]  %s40_s23, 256, %s42_s25, [#allocation6], %s2292_s29, %s2292_s29, %s2293_s30  }
   0x8   :  { %s2294_s13 = smov [#allocation8]   ;;  %s94_s1 = sshll.u32 %s2960_s9, 4  ;;  %s95_s1 = int_to_ptr.hbm [resolvable:$true] %s94_s1 }
   0x9   :  { %s70_s14 = sshll.u32 %s2294_s13, 4  ;;  %s26_s5 = sshll.u32 %s2951_s0, 4  ;;  %s71_s14 = int_to_ptr.vmem [resolvable:$true] %s70_s14  ;;  %s27_s5 = int_to_ptr.hbm [resolvable:$true] %s26_s5 }
   0xa   :  { %73 = dma.hbm_to_vmem [thread:$0]  %s69_s28, 32, %s71_s14, [#allocation9]  }
   0xb   :  { %s2295_s19 = smov [#allocation11]   ;;  %s2296_s21 = smov [#allocation2]  }
   0xc   :  { %s96_s20 = sshll.u32 %s2295_s19, 4  ;;  %s28_s22 = sshll.u32 %s2296_s21, 4  ;;  %s97_s20 = int_to_ptr.vmem [resolvable:$true] %s96_s20  ;;  %s29_s22 = int_to_ptr.vmem [resolvable:$true] %s28_s22 }
   0xd   :  { %99 = dma.hbm_to_vmem [thread:$0]  %s95_s1, 32, %s97_s20, [#allocation12]  }
   0xe   :  { %s55_s25 = sshll.u32 %s2954_s3, 4  ;;  %s81_s0 = sshll.u32 %s2958_s7, 4  ;;  %s56_s25 = int_to_ptr.hbm [resolvable:$true] %s55_s25  ;;  %s82_s0 = int_to_ptr.hbm [resolvable:$true] %s81_s0 }
   0xf   :  { %34 = dma.hbm_to_vmem [thread:$0]  %s27_s5, 256, %s29_s22, [#allocation3], %s2292_s29, %s2292_s29, %s2293_s30  }
  0x10   :  { %s2297_s27 = smov [#allocation7]   ;;  %s2298_s13 = smov [#allocation10]  }
  0x11   :  { %s57_s28 = sshll.u32 %s2297_s27, 4  ;;  %s83_s14 = sshll.u32 %s2298_s13, 4  ;;  %s58_s28 = int_to_ptr.vmem [resolvable:$true] %s57_s28  ;;  %s84_s14 = int_to_ptr.vmem [resolvable:$true] %s83_s14 }
  0x12   :  { %60 = dma.hbm_to_vmem [thread:$0]  %s56_s25, 32, %s58_s28, [#allocation6]  }
  0x13   :  { %s107_s3 = sshll.u32 %s2962_s11, 4  ;;  %s2299_s1 = smov [#allocation13]   ;;  %s108_s3 = int_to_ptr.hbm [resolvable:$true] %s107_s3 }
  0x14   :  { %86 = dma.hbm_to_vmem [thread:$0]  %s82_s0, 32, %s84_s14, [#allocation9]  }
  0x15   :  { %s109_s17 = sshll.u32 %s2299_s1, 4  ;;  %s110_s17 = int_to_ptr.vmem [resolvable:$true] %s109_s17 }
  0x16   :  { %112 = dma.hbm_to_vmem [thread:$0]  %s108_s3, 32, %s110_s17, [#allocation12]  }
  0x17   :  { %2281 = dma.done.wait [#allocation3], 256  }
  0x18   :  { %2282 = vsyncadd [#allocation3], 4294967040 }
  0x19   :  { %2283 = dma.done.wait [#allocation6], 288  }
  0x1a   :  { %2284 = vsyncadd [#allocation6], 4294967008 }
  0x1b   :  { %2285 = dma.done.wait [#allocation9], 64  }
  0x1c   :  { %2286 = vsyncadd [#allocation9], 4294967232 }
  0x1d   :  { %2287 = dma.done.wait [#allocation12], 64  }
  0x1e   :  { %2288 = vsyncadd [#allocation12], 4294967232  ;;  %v141_v0 = vld [vmem:[#allocation2] sm:$0xff]  ;;  %v143_v1 = vld [vmem:[#allocation5] sm:$0xff]  ;;  %vm154_vm0 = vcmask 261120   ;;  %v2300_v4 = vmov 32.0   ;;  %v147_v41 = vlaneseq }
  0x1f   :  { %v2407_v2 = vadd.f32 %v143_v1, %v141_v0  ;;  %2003 = vrcp.f32 %v2300_v4  ;;  %v215_v16 = vld [vmem:[%s2953_s2 + $0x18] sm:$0xff]  ;;  %v214_v17 = vld [vmem:[%s2953_s2 + $0x10] sm:$0xff]  ;;  %v213_v18 = vld [vmem:[%s2953_s2 + $0x8] sm:$0xff]  ;;  %s2301_s26 = smov 120   ;;  %s2302_s0 = smov 96   ;;  %vm250_vm5 = vcmask 64512  }
  0x20   :  { %236 = vmatpush.msra.mxu0 %v215_v16  ;;  %v212_v19 = vld [vmem:[%s2953_s2] sm:$0xff]  ;;  %s2303_s27 = smov 88   ;;  %v148_v42 = vshrl.u32 %v147_v41, 7  ;;  %v150_v43 = vand.u32 127, %v147_v41  ;;  %s2304_s28 = smov 56   ;;  %v142_v61 = vld [vmem:[#allocation2 + $0x8] sm:$0xff] }
  0x21   :  { %v155_v3 = vsel %vm154_vm0, %v2407_v2, 0.0  ;;  %v2432_v29 = vld [vmem:[%s2961_s10] ss:$0 sm:$0xff]  ;;  %v2437_v32 = vld [vmem:[%s2961_s10 + $0x1] ss:$0 sm:$0xff]  ;;  %s2305_s13 = smov 72  }
  0x22   :  { %156 = vadd.xlane.f32.xlu0 %v155_v3  ;;  %237 = vmatpush.msra.mxu0 %v214_v17  ;;  %v2442_v35 = vld [vmem:[#allocation7] ss:$0 sm:$0xff]  ;;  %vm2458_vm6 = vcmp.le.s32.totalorder %v150_v43, %v148_v42  ;;  %s2306_s14 = smov 112   ;;  %s2307_s15 = smov 80   ;;  %v144_v62 = vld [vmem:[#allocation5 + $0x8] sm:$0xff]  ;;  %vm524_vm10 = vcmask 130048  }
  0x23   :  { %s2308_s16 = smov 64   ;;  %s2309_s3 = smov 104   ;;  %v2482_v63 = vadd.f32 %v144_v62, %v142_v61  ;;  %vm526_vm11 = vcmask 195584   ;;  %vm942_vm15 = vcmask 523264  }
  0x24   :  { %238 = vmatpush.msra.mxu0 %v213_v18  ;;  %s2310_s1 = smov 40   ;;  %s2311_s17 = smov 48  }
  0x25   :  { %v2004_v5 = vpop.eup %2003  ;;  %v158_v0 = vsel %vm154_vm0, %v2482_v63, 0.0  ;;  %s2312_s7 = smov 16   ;;  %s2313_s11 = smov 24  }
  0x26   :  { %v162_v6 = vmul.f32 32.0, %v2004_v5  ;;  %vm166_vm1 = vweird.f32 %v2004_v5  ;;  %239 = vmatpush.msra.mxu0 %v212_v19 }
  0x28   :  { %v163_v7 = vsub.f32 1.0, %v162_v6 }
  0x2a   :  { %v164_v8 = vmul.f32 %v2004_v5, %v163_v7 }
  0x2c   :  { %v165_v9 = vadd.f32 %v2004_v5, %v164_v8 }
  0x2e   :  { %v2411_v10 = vsel %vm166_vm1, %v2004_v5, %v165_v9 }
  0x95   :  { %v157_v11 = vpop.xlane.xlu0 %156 }
  0x96   :  { %v168_v12 = vmul.f32 %v2411_v10, %v157_v11 }
  0x98   :  { %v170_v13 = vsub.f32 %v2407_v2, %v168_v12 }
  0x9a   :  { %v172_v14 = vmul.f32 %v170_v13, %v170_v13 }
  0x9c   :  { %v174_v15 = vsel %vm154_vm0, %v172_v14, 0.0 }
  0x9d   :  { %175 = vadd.xlane.f32.xlu0 %v174_v15 }
 0x110   :  { %v176_v20 = vpop.xlane.xlu0 %175 }
 0x111   :  { %v180_v21 = vmul.f32 %v176_v20, %v2411_v10 }
 0x113   :  { %v182_v22 = vadd.f32 1e-05, %v180_v21 }
 0x115   :  { %2005 = vrsqrt.f32 %v182_v22  ;;  %vm190_vm3 = vweird.f32 %v182_v22 }
 0x11b   :  { %v2006_v23 = vpop.eup %2005 }
 0x11c   :  { %v185_v24 = vmul.f32 %v2006_v23, %v182_v22  ;;  %vm191_vm2 = vweird.f32 %v2006_v23 }
 0x11d   :  { %vm192_vm4 = vmor %vm190_vm3, %vm191_vm2 }
 0x11e   :  { %v186_v25 = vmul.f32 %v2006_v23, %v185_v24 }
 0x120   :  { %v187_v26 = vmul.f32 0.5, %v186_v25 }
 0x122   :  { %v188_v27 = vsub.f32 1.5, %v187_v26 }
 0x124   :  { %v189_v28 = vmul.f32 %v2006_v23, %v188_v27 }
 0x126   :  { %v193_v30 = vsel %vm192_vm4, %v2006_v23, %v189_v28 }
 0x127   :  { %v204_v31 = vmul.f32 %v193_v30, %v170_v13 }
 0x129   :  { %v207_v33 = vmul.f32 %v2432_v29, %v204_v31 }
 0x12b   :  { %v210_v34 = vadd.f32 %v2437_v32, %v207_v33 }
 0x12d   :  { %1873 = vmatmul.msk.f32.vlgmr.msra.gmra.mxu0 %vm154_vm0, %v210_v34 }
 0x1aa   :  { %v241_v36 = vpop.f32.mrf.mxu0 }
 0x1ab   :  { %v2445_v37 = vadd.f32 %v2442_v35, %v241_v36 }
 0x1ad   :  { %313 = vrot.lane.b32.xlu2 %v2445_v37, %s2301_s26  ;;  %248 = vrot.lane.b32.xlu1 %v2445_v37, %s2302_s0 }
 0x1b5   :  { %315 = vrot.lane.b32.xlu1 %v2445_v37, %s2303_s27 }
 0x207   :  { %v314_v40 = vpop.permute.xlu2 %313 }
 0x21f   :  { %v249_v38 = vpop.permute.xlu1 %248 }
 0x220   :  { %1875 = vmatpush.xpose.msk.msra.mxu3 %vm250_vm5, %v249_v38 }
 0x223   :  { %1876 = vmatmul.msk.f32.vlgmr.msra.gmra.mxu3 %vm250_vm5, %v2445_v37 }
 0x227   :  { %v316_v39 = vpop.permute.xlu1 %315 }
 0x228   :  { %1878 = vmatpush.xpose.msk.msrb.mxu3 %vm250_vm5, %v316_v39 }
 0x22b   :  { %1879 = vmatmul.msk.f32.vlgmr.msrb.gmra.mxu3 %vm250_vm5, %v314_v40 }
 0x2a6   :  { %v272_v45 = vpop.f32.mrf.mxu3 }
 0x2a7   :  { %v275_v46 = vsel %vm2458_vm6, %v272_v45, -1e+30 }
 0x2a8   :  { %v276_v47 = vsel %vm250_vm5, %v275_v46, -inf }
 0x2a9   :  { %277 = vmax.xlane.f32.xlu2 %v276_v47 }
 0x2ae   :  { %v338_v48 = vpop.f32.mrf.mxu3 }
 0x2af   :  { %v341_v49 = vsel %vm2458_vm6, %v338_v48, -1e+30 }
 0x2b0   :  { %v342_v50 = vsel %vm250_vm5, %v341_v49, -inf }
 0x2b1   :  { %343 = vmax.xlane.f32.xlu0 %v342_v50 }
 0x2c1   :  { %353 = vrot.lane.b32.xlu2 %v2445_v37, %s2304_s28 }
 0x2c9   :  { %447 = vrot.lane.b32.xlu2 %v2445_v37, %s2305_s13 }
 0x2d1   :  { %379 = vrot.lane.b32.xlu2 %v2445_v37, %s2306_s14 }
 0x31c   :  { %v278_v51 = vpop.xlane.xlu2 %277 }
 0x31d   :  { %v279_v52 = vsub.f32 %v275_v46, %v278_v51 }
 0x31f   :  { %v280_v53 = vmul.f32 1.442695, %v279_v52 }
 0x321   :  { %2007 = vpow2.f32 %v280_v53 }
 0x324   :  { %v344_v54 = vpop.xlane.xlu0 %343  ;;  %v354_v1 = vpop.permute.xlu2 %353 }
 0x325   :  { %v345_v55 = vsub.f32 %v341_v49, %v344_v54 }
 0x327   :  { %v2008_v56 = vpop.eup %2007  ;;  %v346_v57 = vmul.f32 1.442695, %v345_v55 }
 0x328   :  { %v282_v58 = vsel %vm250_vm5, %v2008_v56, 0.0 }
 0x329   :  { %2009 = vpow2.f32 %v346_v57  ;;  %283 = vadd.xlane.f32.xlu1 %v282_v58 }
 0x32c   :  { %v448_v4 = vpop.permute.xlu2 %447 }
 0x32f   :  { %v2010_v59 = vpop.eup %2009 }
 0x330   :  { %v348_v60 = vsel %vm250_vm5, %v2010_v59, 0.0 }
 0x331   :  { %349 = vadd.xlane.f32.xlu0 %v348_v60 }
 0x334   :  { %v380_v8 = vpop.permute.xlu2 %379 }
 0x342   :  { %381 = vrot.lane.b32.xlu1 %v2445_v37, %s2307_s15 }
 0x345   :  { %287 = vrot.lane.b32.xlu0 %v2445_v37, %s2308_s16 }
 0x34a   :  { %445 = vrot.lane.b32.xlu1 %v2445_v37, %s2309_s3 }
 0x36f   :  { %159 = vadd.xlane.f32.xlu0 %v158_v0 }
 0x39c   :  { %v284_v3 = vpop.xlane.xlu1 %283 }
 0x39d   :  { %2011 = vrcp.f32 %v284_v3 }
 0x3a3   :  { %v2012_v6 = vpop.eup %2011 }
 0x3a4   :  { %v350_v5 = vpop.xlane.xlu0 %349  ;;  %v286_v11 = vmul.f32 %v2012_v6, %v2008_v56 }
 0x3a5   :  { %2013 = vrcp.f32 %v350_v5 }
 0x3ab   :  { %v2014_v12 = vpop.eup %2013 }
 0x3ac   :  { %v352_v13 = vmul.f32 %v2014_v12, %v2010_v59 }
 0x3b4   :  { %v382_v7 = vpop.permute.xlu1 %381 }
 0x3b5   :  { %1881 = vmatpush.xpose.msk.msra.mxu1 %vm250_vm5, %v382_v7 }
 0x3b7   :  { %v288_v9 = vpop.permute.xlu0 %287 }
 0x3b8   :  { %308 = vmatpush.msra.mxu2 %v288_v9  ;;  %1882 = vmatmul.msk.f32.vlgmr.msra.gmra.mxu1 %vm250_vm5, %v380_v8 }
 0x3b9   :  { %1877 = vmatmul.msk.f32.vlgmr.msra.gmra.mxu2 %vm250_vm5, %v286_v11 }
 0x3ba   :  { %374 = vmatpush.msrb.mxu2 %v354_v1 }
 0x3bc   :  { %1884 = vmatpush.xpose.msk.msra.mxu2 %vm250_vm5, %v448_v4  ;;  %v446_v14 = vpop.permute.xlu1 %445 }
 0x3c1   :  { %1880 = vmatmul.msk.f32.vlgmr.msrb.gmra.mxu2 %vm250_vm5, %v352_v13 }
 0x3c9   :  { %1885 = vmatmul.msk.f32.vlgmr.msra.gmra.mxu2 %vm250_vm5, %v446_v14 }
 0x3e2   :  { %v160_v15 = vpop.xlane.xlu0 %159 }
 0x3e3   :  { %v169_v16 = vmul.f32 %v2411_v10, %v160_v15 }
 0x3e5   :  { %v171_v17 = vsub.f32 %v2482_v63, %v169_v16 }
 0x3e7   :  { %v173_v18 = vmul.f32 %v171_v17, %v171_v17 }
 0x3e9   :  { %v177_v19 = vsel %vm154_vm0, %v173_v18, 0.0 }
 0x3ea   :  { %178 = vadd.xlane.f32.xlu2 %v177_v19 }
 0x402   :  { %485 = vrot.lane.b32.xlu2 %v2445_v37, %s2310_s1 }
 0x435   :  { %v404_v20 = vpop.f32.mrf.mxu1 }
 0x436   :  { %v407_v21 = vsel %vm2458_vm6, %v404_v20, -1e+30 }
 0x437   :  { %v408_v22 = vsel %vm250_vm5, %v407_v21, -inf }
 0x438   :  { %409 = vmax.xlane.f32.xlu1 %v408_v22 }
 0x43c   :  { %v2507_v47 = vpop.f32.mrf.mxu2 }
 0x45d   :  { %v179_v23 = vpop.xlane.xlu2 %178 }
 0x45e   :  { %v181_v24 = vmul.f32 %v179_v23, %v2411_v10 }
 0x460   :  { %v183_v25 = vadd.f32 1e-05, %v181_v24 }
 0x462   :  { %2015 = vrsqrt.f32 %v183_v25  ;;  %vm200_vm8 = vweird.f32 %v183_v25 }
 0x465   :  { %v486_v26 = vpop.permute.xlu2 %485 }
 0x466   :  { %506 = vmatpush.msrb.mxu1 %v486_v26 }
 0x468   :  { %v2016_v27 = vpop.eup %2015 }
 0x469   :  { %v195_v28 = vmul.f32 %v2016_v27, %v183_v25  ;;  %vm201_vm7 = vweird.f32 %v2016_v27 }
 0x46a   :  { %vm202_vm9 = vmor %vm200_vm8, %vm201_vm7 }
 0x46b   :  { %v196_v30 = vmul.f32 %v2016_v27, %v195_v28 }
 0x46d   :  { %v197_v31 = vmul.f32 0.5, %v196_v30 }
 0x46f   :  { %v198_v33 = vsub.f32 1.5, %v197_v31 }
 0x471   :  { %v199_v34 = vmul.f32 %v2016_v27, %v198_v33 }
 0x473   :  { %v203_v36 = vsel %vm202_vm9, %v2016_v27, %v199_v34 }
 0x474   :  { %v205_v38 = vmul.f32 %v203_v36, %v171_v17 }
 0x476   :  { %v208_v39 = vmul.f32 %v2432_v29, %v205_v38  ;;  %v809_v38 = vld [vmem:[%s2955_s4 + $0x18] sm:$0xff] }
 0x478   :  { %v211_v40 = vadd.f32 %v2437_v32, %v208_v39  ;;  %v376_v32 = vpop.f32.mrf.mxu2  ;;  %v808_v39 = vld [vmem:[%s2955_s4 + $0x10] sm:$0xff] }
 0x47a   :  { %1874 = vmatmul.msk.f32.gmra.mxu0 %vm154_vm0, %v211_v40  ;;  %v807_v40 = vld [vmem:[%s2955_s4 + $0x8] sm:$0xff] }
 0x4ab   :  { %v410_v41 = vpop.xlane.xlu1 %409 }
 0x4ac   :  { %v411_v42 = vsub.f32 %v407_v21, %v410_v41 }
 0x4ae   :  { %v412_v43 = vmul.f32 1.442695, %v411_v42  ;;  %v806_v42 = vld [vmem:[%s2955_s4] sm:$0xff] }
 0x4b0   :  { %2017 = vpow2.f32 %v412_v43 }
 0x4b6   :  { %v2018_v45 = vpop.eup %2017 }
 0x4b7   :  { %v414_v46 = vsel %vm250_vm5, %v2018_v45, 0.0 }
 0x4b8   :  { %415 = vadd.xlane.f32.xlu0 %v414_v46 }
 0x4cc   :  { %419 = vrot.lane.b32.xlu0 %v2445_v37, %s2311_s17 }
 0x4f7   :  { %v244_v48 = vpop.f32.mrf.mxu0 }
 0x4f8   :  { %v2510_v29 = vadd.f32 %v2442_v35, %v244_v48  ;;  %v470_v35 = vpop.f32.mrf.mxu2 }
 0x4f9   :  { %v473_v37 = vsel %vm2458_vm6, %v470_v35, -1e+30 }
 0x4fa   :  { %727 = vrot.lane.b32.xlu2 %v2510_v29, %s2305_s13  ;;  %529 = vrot.lane.b32.xlu1 %v2510_v29, %s2302_s0  ;;  %v474_v49 = vsel %vm250_vm5, %v473_v37, -inf }
 0x4fb   :  { %595 = vrot.lane.b32.xlu0 %v2510_v29, %s2303_s27 }
 0x502   :  { %512 = vrot.lane.b32.xlu2 %v376_v32, %s2293_s30  ;;  %659 = vrot.lane.b32.xlu1 %v2510_v29, %s2306_s14 }
 0x503   :  { %593 = vrot.lane.b32.xlu0 %v2510_v29, %s2301_s26 }
 0x52b   :  { %v416_v50 = vpop.xlane.xlu0 %415 }
 0x52c   :  { %2019 = vrcp.f32 %v416_v50 }
 0x52d   :  { %475 = vmax.xlane.f32.xlu0 %v474_v49 }
 0x532   :  { %v2020_v51 = vpop.eup %2019 }
 0x533   :  { %v418_v52 = vmul.f32 %v2020_v51, %v2018_v45 }
 0x53e   :  { %v420_v53 = vpop.permute.xlu0 %419 }
 0x53f   :  { %440 = vmatpush.msra.mxu3 %v420_v53 }
 0x540   :  { %1883 = vmatmul.msk.f32.vlgmr.msra.gmra.mxu3 %vm250_vm5, %v418_v52 }
 0x541   :  { %661 = vrot.lane.b32.xlu0 %v2510_v29, %s2307_s15 }
 0x554   :  { %v728_v56 = vpop.permute.xlu2 %727 }
 0x55c   :  { %v513_v15 = vpop.permute.xlu2 %512 }
 0x55d   :  { %v523_v48 = vsel %vm250_vm5, %v2507_v47, %v513_v15 }
 0x56c   :  { %v530_v54 = vpop.permute.xlu1 %529 }
 0x56d   :  { %v596_v55 = vpop.permute.xlu0 %595  ;;  %1887 = vmatpush.xpose.msk.msrb.mxu3 %vm250_vm5, %v530_v54 }
 0x56e   :  { %1890 = vmatpush.xpose.msk.msrb.mxu2 %vm250_vm5, %v596_v55 }
 0x570   :  { %1888 = vmatmul.msk.f32.vlgmr.msrb.gmra.mxu3 %vm250_vm5, %v2510_v29 }
 0x572   :  { %1896 = vmatpush.xpose.msk.msra.mxu2 %vm250_vm5, %v728_v56 }
 0x574   :  { %v660_v1 = vpop.permute.xlu1 %659 }
 0x575   :  { %v594_v57 = vpop.permute.xlu0 %593 }
 0x576   :  { %1891 = vmatmul.msk.f32.vlgmr.msrb.gmra.mxu2 %vm250_vm5, %v594_v57 }
 0x5a0   :  { %v476_v58 = vpop.xlane.xlu0 %475 }
 0x5a1   :  { %v477_v59 = vsub.f32 %v473_v37, %v476_v58  ;;  %v2589_v58 = vld [vmem:[#allocation8] ss:$0 sm:$0xff] }
 0x5a3   :  { %v478_v60 = vmul.f32 1.442695, %v477_v59 }
 0x5a5   :  { %2021 = vpow2.f32 %v478_v60 }
 0x5ab   :  { %v2022_v61 = vpop.eup %2021 }
 0x5ac   :  { %v480_v62 = vsel %vm250_vm5, %v2022_v61, 0.0 }
 0x5ad   :  { %481 = vadd.xlane.f32.xlu0 %v480_v62 }
 0x5b3   :  { %v662_v0 = vpop.permute.xlu0 %661 }
 0x5b4   :  { %1893 = vmatpush.xpose.msk.msra.mxu3 %vm250_vm5, %v662_v0 }
 0x5b7   :  { %1894 = vmatmul.msk.f32.vlgmr.msra.gmra.mxu3 %vm250_vm5, %v660_v1 }
 0x5b8   :  { %828 = vmatpush.msrb.mxu3 %v809_v38 }
 0x5ba   :  { %829 = vmatpush.msrb.mxu3 %v808_v39  ;;  %v939_v39 = vld [vmem:[%s2959_s8 + $0x28] sm:$0xff] }
 0x5bc   :  { %830 = vmatpush.msrb.mxu3 %v807_v40 }
 0x5be   :  { %831 = vmatpush.msrb.mxu3 %v806_v42  ;;  %v938_v42 = vld [vmem:[%s2959_s8 + $0x20] sm:$0xff] }
 0x5c1   :  { %725 = vrot.lane.b32.xlu0 %v2510_v29, %s2309_s3 }
 0x5c3   :  { %v442_v3 = vpop.f32.mrf.mxu3 }
 0x5c4   :  { %516 = vrot.lane.b32.xlu1 %v442_v3, %s2312_s7 }
 0x5f3   :  { %v552_v4 = vpop.f32.mrf.mxu3 }
 0x5f4   :  { %v555_v5 = vsel %vm2458_vm6, %v552_v4, -1e+30 }
 0x5f5   :  { %v556_v6 = vsel %vm250_vm5, %v555_v5, -inf }
 0x5f6   :  { %557 = vmax.xlane.f32.xlu2 %v556_v6 }
 0x5f9   :  { %v618_v7 = vpop.f32.mrf.mxu2 }
 0x5fa   :  { %v621_v8 = vsel %vm2458_vm6, %v618_v7, -1e+30 }
 0x5fb   :  { %v622_v9 = vsel %vm250_vm5, %v621_v8, -inf }
 0x5fc   :  { %623 = vmax.xlane.f32.xlu1 %v622_v9 }
 0x620   :  { %v482_v11 = vpop.xlane.xlu0 %481 }
 0x621   :  { %2023 = vrcp.f32 %v482_v11 }
 0x627   :  { %v2024_v12 = vpop.eup %2023 }
 0x628   :  { %v484_v13 = vmul.f32 %v2024_v12, %v2022_v61 }
 0x62a   :  { %1886 = vmatmul.msk.f32.vlgmr.msrb.gmra.mxu1 %vm250_vm5, %v484_v13 }
 0x633   :  { %v726_v14 = vpop.permute.xlu0 %725 }
 0x634   :  { %1897 = vmatmul.msk.f32.vlgmr.msra.gmra.mxu2 %vm250_vm5, %v726_v14 }
 0x636   :  { %v517_v21 = vpop.permute.xlu1 %516 }
 0x637   :  { %v525_v32 = vsel %vm524_vm10, %v523_v48, %v517_v21  ;;  %v900_v21 = vld [vmem:[%s2957_s6 + $0x18] sm:$0xff] }
 0x638   :  { %v937_v48 = vld [vmem:[%s2959_s8 + $0x18] sm:$0xff] }
 0x63a   :  { %v684_v33 = vpop.f32.mrf.mxu3 }
 0x63b   :  { %v687_v34 = vsel %vm2458_vm6, %v684_v33, -1e+30 }
 0x63c   :  { %v688_v36 = vsel %vm250_vm5, %v687_v34, -inf }
 0x669   :  { %v558_v16 = vpop.xlane.xlu2 %557 }
 0x66a   :  { %v559_v17 = vsub.f32 %v555_v5, %v558_v16 }
 0x66c   :  { %v560_v18 = vmul.f32 1.442695, %v559_v17 }
 0x66e   :  { %2025 = vpow2.f32 %v560_v18 }
 0x66f   :  { %v624_v23 = vpop.xlane.xlu1 %623 }
 0x670   :  { %v625_v24 = vsub.f32 %v621_v8, %v624_v23  ;;  %v898_v23 = vld [vmem:[%s2957_s6 + $0x8] sm:$0xff] }
 0x672   :  { %v626_v25 = vmul.f32 1.442695, %v625_v24  ;;  %v897_v24 = vld [vmem:[%s2957_s6] sm:$0xff] }
 0x674   :  { %v2026_v19 = vpop.eup %2025  ;;  %2027 = vpow2.f32 %v626_v25 }
 0x675   :  { %v562_v20 = vsel %vm250_vm5, %v2026_v19, 0.0 }
 0x676   :  { %563 = vadd.xlane.f32.xlu1 %v562_v20 }
 0x67a   :  { %v2556_v30 = vpop.eup %2027 }
 0x67b   :  { %v628_v31 = vsel %vm250_vm5, %v2556_v30, 0.0 }
 0x68f   :  { %567 = vrot.lane.b32.xlu1 %v2510_v29, %s2308_s16 }
 0x6a7   :  { %v508_v22 = vpop.f32.mrf.mxu1 }
 0x6a8   :  { %520 = vrot.lane.b32.xlu0 %v508_v22, %s2313_s11  ;;  %v899_v22 = vld [vmem:[%s2957_s6 + $0x10] sm:$0xff] }
 0x6b7   :  { %v750_v26 = vpop.f32.mrf.mxu2 }
 0x6b8   :  { %v753_v27 = vsel %vm2458_vm6, %v750_v26, -1e+30 }
 0x6b9   :  { %v754_v28 = vsel %vm250_vm5, %v753_v27, -inf }
 0x6ba   :  { %755 = vmax.xlane.f32.xlu2 %v754_v28 }
 0x6c2   :  { %629 = vadd.xlane.f32.xlu2 %v628_v31 }
 0x6d2   :  { %689 = vmax.xlane.f32.xlu0 %v688_v36  ;;  %v940_v36 = vld [vmem:[%s2959_s8 + $0x30] sm:$0xff] }
 0x6e9   :  { %v564_v41 = vpop.xlane.xlu1 %563 }
 0x6ea   :  { %2029 = vrcp.f32 %v564_v41  ;;  %v2632_v41 = vld [vmem:[%s2961_s10 + $0x2] ss:$0 sm:$0xff] }
 0x6f0   :  { %v2030_v43 = vpop.eup %2029 }
 0x6f1   :  { %v566_v46 = vmul.f32 %v2030_v43, %v2026_v19 }
 0x701   :  { %v568_v45 = vpop.permute.xlu1 %567 }
 0x702   :  { %588 = vmatpush.msrb.mxu0 %v568_v45 }
 0x703   :  { %1889 = vmatmul.msk.f32.vlgmr.msrb.gmra.mxu0 %vm250_vm5, %v566_v46  ;;  %v2640_v46 = vld [vmem:[%s2961_s10 + $0x3] ss:$0 sm:$0xff] }
 0x71a   :  { %v521_v35 = vpop.permute.xlu0 %520 }
 0x71b   :  { %v527_v37 = vsel %vm526_vm11, %v525_v32, %v521_v35 }
 0x71c   :  { %1899 = vmatmul.msk.f32.vlgmr.msrb.gmra.mxu3 %vm154_vm0, %v527_v37 }
 0x72d   :  { %v756_v49 = vpop.xlane.xlu2 %755 }
 0x72e   :  { %v757_v50 = vsub.f32 %v753_v27, %v756_v49 }
 0x730   :  { %v758_v51 = vmul.f32 1.442695, %v757_v50 }
 0x732   :  { %2031 = vpow2.f32 %v758_v51 }
 0x735   :  { %v630_v0 = vpop.xlane.xlu2 %629 }
 0x738   :  { %v2032_v52 = vpop.eup %2031 }
 0x739   :  { %v760_v53 = vsel %vm250_vm5, %v2032_v52, 0.0 }
 0x73a   :  { %761 = vadd.xlane.f32.xlu2 %v760_v53 }
 0x745   :  { %v690_v54 = vpop.xlane.xlu0 %689 }
 0x746   :  { %v691_v55 = vsub.f32 %v687_v34, %v690_v54  ;;  %v941_v34 = vld [vmem:[%s2959_s8 + $0x38] sm:$0xff]  ;;  %v936_v54 = vld [vmem:[%s2959_s8 + $0x10] sm:$0xff] }
 0x747   :  { %957 = vmatpush.msrb.mxu2 %v941_v34 }
 0x748   :  { %v692_v56 = vmul.f32 1.442695, %v691_v55  ;;  %v935_v55 = vld [vmem:[%s2959_s8 + $0x8] sm:$0xff] }
 0x749   :  { %958 = vmatpush.msrb.mxu2 %v940_v36 }
 0x74a   :  { %2033 = vpow2.f32 %v692_v56  ;;  %v934_v56 = vld [vmem:[%s2959_s8] sm:$0xff] }
 0x74b   :  { %959 = vmatpush.msrb.mxu2 %v939_v39 }
 0x74d   :  { %960 = vmatpush.msrb.mxu2 %v938_v42 }
 0x74f   :  { %961 = vmatpush.msrb.mxu2 %v937_v48 }
 0x750   :  { %v2034_v47 = vpop.eup %2033 }
 0x751   :  { %v694_v57 = vsel %vm250_vm5, %v2034_v47, 0.0  ;;  %962 = vmatpush.msrb.mxu2 %v936_v54 }
 0x752   :  { %695 = vadd.xlane.f32.xlu0 %v694_v57  ;;  %699 = vrot.lane.b32.xlu2 %v2510_v29, %s2311_s17 }
 0x753   :  { %963 = vmatpush.msrb.mxu2 %v935_v55 }
 0x755   :  { %964 = vmatpush.msrb.mxu2 %v934_v56 }
 0x766   :  { %633 = vrot.lane.b32.xlu0 %v2510_v29, %s2304_s28 }
 0x76e   :  { %765 = vrot.lane.b32.xlu0 %v2510_v29, %s2310_s1 }
 0x780   :  { %v590_v17 = vpop.f32.mrf.mxu0 }
 0x79f   :  { %v833_v59 = vpop.f32.mrf.mxu3 }
 0x7a0   :  { %v839_v60 = vadd.f32 %v833_v59, %v2407_v2 }
 0x7a2   :  { %v2593_v61 = vadd.f32 %v2589_v58, %v839_v60 }
 0x7a4   :  { %v847_v62 = vsel %vm154_vm0, %v2593_v61, 0.0 }
 0x7a5   :  { %848 = vadd.xlane.f32.xlu1 %v847_v62 }
 0x7ad   :  { %v762_v1 = vpop.xlane.xlu2 %761 }
 0x7b5   :  { %v700_v3 = vpop.permute.xlu2 %699 }
 0x7b6   :  { %720 = vmatpush.msra.mxu0 %v700_v3 }
 0x7b8   :  { %921 = vmatpush.msrb.mxu0 %v900_v21 }
 0x7ba   :  { %922 = vmatpush.msrb.mxu0 %v899_v22 }
 0x7bc   :  { %923 = vmatpush.msrb.mxu0 %v898_v23 }
 0x7be   :  { %924 = vmatpush.msrb.mxu0 %v897_v24 }
 0x7c5   :  { %v696_v4 = vpop.xlane.xlu0 %695 }
 0x7c6   :  { %2035 = vrcp.f32 %v696_v4  ;;  %v2671_v4 = vld [vmem:[#allocation11] ss:$0 sm:$0xff] }
 0x7c7   :  { %2037 = vrcp.f32 %v630_v0 }
 0x7c8   :  { %2039 = vrcp.f32 %v762_v1 }
 0x7cc   :  { %v2036_v5 = vpop.eup %2035 }
 0x7cd   :  { %v698_v29 = vmul.f32 %v2036_v5, %v2034_v47  ;;  %v2038_v6 = vpop.eup %2037  ;;  %v2661_v47 = vld [vmem:[#allocation10] ss:$0 sm:$0xff] }
 0x7ce   :  { %v632_v2 = vmul.f32 %v2038_v6, %v2556_v30  ;;  %v2040_v8 = vpop.eup %2039 }
 0x7cf   :  { %1895 = vmatmul.msk.f32.vlgmr.msra.gmra.mxu0 %vm250_vm5, %v698_v29  ;;  %v764_v9 = vmul.f32 %v2040_v8, %v2032_v52 }
 0x7d8   :  { %v634_v7 = vpop.permute.xlu0 %633 }
 0x7d9   :  { %654 = vmatpush.msra.mxu1 %v634_v7 }
 0x7da   :  { %1892 = vmatmul.msk.f32.vlgmr.msra.gmra.mxu1 %vm250_vm5, %v632_v2 }
 0x7e0   :  { %v766_v11 = vpop.permute.xlu0 %765 }
 0x7e1   :  { %786 = vmatpush.msrb.mxu1 %v766_v11 }
 0x7e2   :  { %1898 = vmatmul.msk.f32.vlgmr.msrb.gmra.mxu1 %vm250_vm5, %v764_v9 }
 0x818   :  { %v849_v12 = vpop.xlane.xlu1 %848 }
 0x819   :  { %v853_v13 = vmul.f32 %v849_v12, %v2411_v10 }
 0x81b   :  { %v855_v14 = vsub.f32 %v2593_v61, %v853_v13 }
 0x81d   :  { %v857_v15 = vmul.f32 %v855_v14, %v855_v14 }
 0x81f   :  { %v859_v16 = vsel %vm154_vm0, %v857_v15, 0.0 }
 0x820   :  { %860 = vadd.xlane.f32.xlu0 %v859_v16 }
 0x84c   :  { %v722_v19 = vpop.f32.mrf.mxu0 }
 0x857   :  { %v656_v18 = vpop.f32.mrf.mxu1 }
 0x858   :  { %792 = vrot.lane.b32.xlu2 %v656_v18, %s2293_s30 }
 0x85f   :  { %v788_v20 = vpop.f32.mrf.mxu1 }
 0x860   :  { %796 = vrot.lane.b32.xlu2 %v722_v19, %s2312_s7 }
 0x868   :  { %800 = vrot.lane.b32.xlu2 %v788_v20, %s2313_s11 }
 0x893   :  { %v861_v25 = vpop.xlane.xlu0 %860 }
 0x894   :  { %v865_v26 = vmul.f32 %v861_v25, %v2411_v10 }
 0x896   :  { %v867_v27 = vadd.f32 1e-05, %v865_v26 }
 0x898   :  { %2041 = vrsqrt.f32 %v867_v27  ;;  %vm875_vm13 = vweird.f32 %v867_v27 }
 0x89e   :  { %v2042_v28 = vpop.eup %2041 }
 0x89f   :  { %v870_v30 = vmul.f32 %v2042_v28, %v867_v27  ;;  %vm876_vm12 = vweird.f32 %v2042_v28 }
 0x8a0   :  { %vm877_vm14 = vmor %vm875_vm13, %vm876_vm12 }
 0x8a1   :  { %v871_v31 = vmul.f32 %v2042_v28, %v870_v30  ;;  %v1909_v30 = vld [vmem:[%s2953_s2 + $0x30] sm:$0xff] }
 0x8a3   :  { %v872_v33 = vmul.f32 0.5, %v871_v31  ;;  %v1908_v31 = vld [vmem:[%s2953_s2 + $0x28] sm:$0xff] }
 0x8a5   :  { %v873_v38 = vsub.f32 1.5, %v872_v33  ;;  %v1907_v33 = vld [vmem:[%s2953_s2 + $0x20] sm:$0xff] }
 0x8a7   :  { %v874_v40 = vmul.f32 %v2042_v28, %v873_v38 }
 0x8a9   :  { %v878_v43 = vsel %vm877_vm14, %v2042_v28, %v874_v40  ;;  %v1910_v28 = vld [vmem:[%s2953_s2 + $0x38] sm:$0xff] }
 0x8aa   :  { %v889_v45 = vmul.f32 %v878_v43, %v855_v14  ;;  %1056 = vmatpush.msra.mxu1 %v1910_v28 }
 0x8ac   :  { %v892_v32 = vmul.f32 %v2632_v41, %v889_v45  ;;  %1057 = vmatpush.msra.mxu1 %v1909_v30 }
 0x8ae   :  { %v895_v35 = vadd.f32 %v2640_v46, %v892_v32  ;;  %1058 = vmatpush.msra.mxu1 %v1908_v31 }
 0x8b0   :  { %1901 = vmatmul.msk.f32.vlgmr.msrb.gmra.mxu0 %vm154_vm0, %v895_v35  ;;  %1059 = vmatpush.msra.mxu1 %v1907_v33  ;;  %v1994_v35 = vld [vmem:[%s2961_s10 + $0x5] ss:$0 sm:$0xff] }
 0x8b2   :  { %v793_v37 = vpop.permute.xlu2 %792 }
 0x8b3   :  { %v803_v50 = vsel %vm250_vm5, %v590_v17, %v793_v37 }
 0x8ba   :  { %v797_v49 = vpop.permute.xlu2 %796 }
 0x8bb   :  { %v804_v51 = vsel %vm524_vm10, %v803_v50, %v797_v49 }
 0x8c2   :  { %v801_v52 = vpop.permute.xlu2 %800 }
 0x8c3   :  { %v805_v53 = vsel %vm526_vm11, %v804_v51, %v801_v52 }
 0x8c4   :  { %1900 = vmatmul.msk.f32.gmra.mxu3 %vm154_vm0, %v805_v53  ;;  %v1995_v53 = vld [vmem:[#allocation7 + $0x1] ss:$0 sm:$0xff] }
 0x92d   :  { %v926_v57 = vpop.f32.mrf.mxu0 }
 0x92e   :  { %v927_v59 = vadd.f32 %v2661_v47, %v926_v57 }
 0x930   :  { %v932_v60 = vmax.f32 %v927_v59, 0.0 }
 0x932   :  { %1903 = vmatmul.msk.f32.vlgmr.msrb.gmra.mxu2 %vm942_vm15, %v932_v60 }
 0x947   :  { %v836_v62 = vpop.f32.mrf.mxu3 }
 0x948   :  { %v840_v0 = vadd.f32 %v836_v62, %v2482_v63 }
 0x94a   :  { %v2667_v1 = vadd.f32 %v2589_v58, %v840_v0 }
 0x94c   :  { %v850_v3 = vsel %vm154_vm0, %v2667_v1, 0.0 }
 0x94d   :  { %851 = vadd.xlane.f32.xlu2 %v850_v3 }
 0x9b5   :  { %v966_v5 = vpop.f32.mrf.mxu2 }
 0x9b6   :  { %v972_v29 = vadd.f32 %v966_v5, %v2593_v61 }
 0x9b8   :  { %v2675_v6 = vadd.f32 %v2671_v4, %v972_v29 }
 0x9ba   :  { %v981_v2 = vsel %vm154_vm0, %v2675_v6, 0.0 }
 0x9bb   :  { %982 = vadd.xlane.f32.xlu0 %v981_v2 }
 0x9c0   :  { %v852_v63 = vpop.xlane.xlu2 %851 }
 0x9c1   :  { %v854_v58 = vmul.f32 %v852_v63, %v2411_v10 }
 0x9c3   :  { %v856_v7 = vsub.f32 %v2667_v1, %v854_v58 }
 0x9c5   :  { %v858_v8 = vmul.f32 %v856_v7, %v856_v7 }
 0x9c7   :  { %v862_v9 = vsel %vm154_vm0, %v858_v8, 0.0 }
 0x9c8   :  { %863 = vadd.xlane.f32.xlu1 %v862_v9 }
 0xa2e   :  { %v983_v11 = vpop.xlane.xlu0 %982 }
 0xa2f   :  { %v987_v12 = vmul.f32 %v983_v11, %v2411_v10 }
 0xa31   :  { %v989_v61 = vsub.f32 %v2675_v6, %v987_v12 }
 0xa33   :  { %v991_v13 = vmul.f32 %v989_v61, %v989_v61 }
 0xa35   :  { %v993_v14 = vsel %vm154_vm0, %v991_v13, 0.0 }
 0xa36   :  { %994 = vadd.xlane.f32.xlu1 %v993_v14 }
 0xa3b   :  { %v864_v15 = vpop.xlane.xlu1 %863 }
 0xa3c   :  { %v866_v16 = vmul.f32 %v864_v15, %v2411_v10 }
 0xa3e   :  { %v868_v17 = vadd.f32 1e-05, %v866_v16 }
 0xa40   :  { %2043 = vrsqrt.f32 %v868_v17  ;;  %vm885_vm2 = vweird.f32 %v868_v17 }
 0xa46   :  { %v2044_v18 = vpop.eup %2043 }
 0xa47   :  { %v880_v19 = vmul.f32 %v2044_v18, %v868_v17  ;;  %vm886_vm1 = vweird.f32 %v2044_v18 }
 0xa48   :  { %vm887_vm3 = vmor %vm885_vm2, %vm886_vm1 }
 0xa49   :  { %v881_v20 = vmul.f32 %v2044_v18, %v880_v19 }
 0xa4b   :  { %v882_v21 = vmul.f32 0.5, %v881_v20 }
 0xa4d   :  { %v883_v22 = vsub.f32 1.5, %v882_v21 }
 0xa4f   :  { %v884_v23 = vmul.f32 %v2044_v18, %v883_v22 }
 0xa51   :  { %v888_v24 = vsel %vm887_vm3, %v2044_v18, %v884_v23 }
 0xa52   :  { %v890_v25 = vmul.f32 %v888_v24, %v856_v7 }
 0xa54   :  { %v893_v26 = vmul.f32 %v2632_v41, %v890_v25 }
 0xa56   :  { %v896_v27 = vadd.f32 %v2640_v46, %v893_v26  ;;  %v1993_v46 = vld [vmem:[%s2961_s10 + $0x4] ss:$0 sm:$0xff] }
 0xa58   :  { %1902 = vmatmul.msk.f32.gmra.mxu0 %vm154_vm0, %v896_v27 }
 0xaa9   :  { %v995_v34 = vpop.xlane.xlu1 %994 }
 0xaaa   :  { %v999_v36 = vmul.f32 %v995_v34, %v2411_v10 }
 0xaac   :  { %v1001_v38 = vadd.f32 1e-05, %v999_v36 }
 0xaae   :  { %2045 = vrsqrt.f32 %v1001_v38  ;;  %vm1009_vm7 = vweird.f32 %v1001_v38 }
 0xab4   :  { %v2046_v39 = vpop.eup %2045 }
 0xab5   :  { %v1004_v40 = vmul.f32 %v2046_v39, %v1001_v38  ;;  %vm1010_vm4 = vweird.f32 %v2046_v39 }
 0xab6   :  { %vm1011_vm8 = vmor %vm1009_vm7, %vm1010_vm4 }
 0xab7   :  { %v1005_v41 = vmul.f32 %v2046_v39, %v1004_v40 }
 0xab9   :  { %v1006_v42 = vmul.f32 0.5, %v1005_v41 }
 0xabb   :  { %v1007_v43 = vsub.f32 1.5, %v1006_v42 }
 0xabd   :  { %v1008_v45 = vmul.f32 %v2046_v39, %v1007_v43 }
 0xabf   :  { %v1012_v48 = vsel %vm1011_vm8, %v2046_v39, %v1008_v45 }
 0xac0   :  { %v1023_v32 = vmul.f32 %v1012_v48, %v989_v61 }
 0xac2   :  { %v1026_v37 = vmul.f32 %v1993_v46, %v1023_v32 }
 0xac4   :  { %v1029_v49 = vadd.f32 %v1994_v35, %v1026_v37 }
 0xac6   :  { %1911 = vmatmul.msk.f32.vlgmr.msra.gmra.mxu1 %vm154_vm0, %v1029_v49 }
 0xad5   :  { %v929_v50 = vpop.f32.mrf.mxu0 }
 0xad6   :  { %v930_v51 = vadd.f32 %v2661_v47, %v929_v50 }
 0xad8   :  { %v933_v52 = vmax.f32 %v930_v51, 0.0 }
 0xada   :  { %1904 = vmatmul.msk.f32.gmra.mxu2 %vm942_vm15, %v933_v52 }
 0xb43   :  { %v1061_v54 = vpop.f32.mrf.mxu1 }
 0xb44   :  { %v2711_v55 = vadd.f32 %v1995_v53, %v1061_v54 }
 0xb46   :  { %1132 = vrot.lane.b32.xlu2 %v2711_v55, %s2301_s26  ;;  %1068 = vrot.lane.b32.xlu0 %v2711_v55, %s2302_s0 }
 0xb4e   :  { %1134 = vrot.lane.b32.xlu0 %v2711_v55, %s2303_s27 }
 0xb56   :  { %1200 = vrot.lane.b32.xlu0 %v2711_v55, %s2307_s15 }
 0xb5d   :  { %v969_v56 = vpop.f32.mrf.mxu2 }
 0xb5e   :  { %v973_v47 = vadd.f32 %v969_v56, %v2667_v1  ;;  %1266 = vrot.lane.b32.xlu0 %v2711_v55, %s2305_s13 }
 0xb60   :  { %v2725_v57 = vadd.f32 %v2671_v4, %v973_v47 }
 0xb62   :  { %v984_v59 = vsel %vm154_vm0, %v2725_v57, 0.0 }
 0xb63   :  { %985 = vadd.xlane.f32.xlu1 %v984_v59 }
 0xb66   :  { %1198 = vrot.lane.b32.xlu0 %v2711_v55, %s2306_s14 }
 0xba0   :  { %v1133_v21 = vpop.permute.xlu2 %1132 }
 0xbb8   :  { %v1069_v60 = vpop.permute.xlu0 %1068 }
 0xbb9   :  { %1913 = vmatpush.xpose.msk.msra.mxu3 %vm250_vm5, %v1069_v60 }
 0xbbc   :  { %1914 = vmatmul.msk.f32.vlgmr.msra.gmra.mxu3 %vm250_vm5, %v2711_v55 }
 0xbc0   :  { %v1135_v62 = vpop.permute.xlu0 %1134 }
 0xbc1   :  { %1916 = vmatpush.xpose.msk.msrb.mxu1 %vm250_vm5, %v1135_v62 }
 0xbc8   :  { %v1201_v0 = vpop.permute.xlu0 %1200 }
 0xbd0   :  { %v1267_v1 = vpop.permute.xlu0 %1266 }
 0xbd1   :  { %1922 = vmatpush.xpose.msk.msra.mxu1 %vm250_vm5, %v1267_v1 }
 0xbd6   :  { %v986_v3 = vpop.xlane.xlu1 %985 }
 0xbd7   :  { %v988_v4 = vmul.f32 %v986_v3, %v2411_v10 }
 0xbd8   :  { %v1199_v38 = vpop.permute.xlu0 %1198 }
 0xbd9   :  { %v990_v5 = vsub.f32 %v2725_v57, %v988_v4 }
 0xbdb   :  { %v992_v29 = vmul.f32 %v990_v5, %v990_v5 }
 0xbdd   :  { %v996_v2 = vsel %vm154_vm0, %v992_v29, 0.0 }
 0xbde   :  { %997 = vadd.xlane.f32.xlu1 %v996_v2 }
 0xc3f   :  { %v1091_v63 = vpop.f32.mrf.mxu3 }
 0xc40   :  { %v1094_v58 = vsel %vm2458_vm6, %v1091_v63, -1e+30 }
 0xc41   :  { %v1095_v7 = vsel %vm250_vm5, %v1094_v58, -inf }
 0xc42   :  { %1096 = vmax.xlane.f32.xlu1 %v1095_v7 }
 0xc51   :  { %v998_v8 = vpop.xlane.xlu1 %997 }
 0xc52   :  { %v1000_v9 = vmul.f32 %v998_v8, %v2411_v10 }
 0xc54   :  { %v1002_v11 = vadd.f32 1e-05, %v1000_v9 }
 0xc56   :  { %2047 = vrsqrt.f32 %v1002_v11  ;;  %vm1019_vm12 = vweird.f32 %v1002_v11 }
 0xc5b   :  { %1106 = vrot.lane.b32.xlu1 %v2711_v55, %s2308_s16 }
 0xc5c   :  { %v2048_v12 = vpop.eup %2047 }
 0xc5d   :  { %v1014_v61 = vmul.f32 %v2048_v12, %v1002_v11  ;;  %vm1020_vm9 = vweird.f32 %v2048_v12 }
 0xc5e   :  { %vm1021_vm13 = vmor %vm1019_vm12, %vm1020_vm9 }
 0xc5f   :  { %v1015_v13 = vmul.f32 %v2048_v12, %v1014_v61 }
 0xc61   :  { %v1016_v14 = vmul.f32 0.5, %v1015_v13 }
 0xc63   :  { %v1017_v15 = vsub.f32 1.5, %v1016_v14  ;;  %1264 = vrot.lane.b32.xlu1 %v2711_v55, %s2309_s3 }
 0xc65   :  { %v1018_v16 = vmul.f32 %v2048_v12, %v1017_v15 }
 0xc67   :  { %v1022_v17 = vsel %vm1021_vm13, %v2048_v12, %v1018_v16 }
 0xc68   :  { %v1024_v18 = vmul.f32 %v1022_v17, %v990_v5 }
 0xc6a   :  { %v1027_v19 = vmul.f32 %v1993_v46, %v1024_v18 }
 0xc6c   :  { %v1030_v20 = vadd.f32 %v1994_v35, %v1027_v19 }
 0xc6e   :  { %1912 = vmatmul.msk.f32.gmra.mxu1 %vm154_vm0, %v1030_v20 }
 0xc76   :  { %1917 = vmatmul.msk.f32.vlgmr.msrb.gmra.mxu1 %vm250_vm5, %v1133_v21 }
 0xcb5   :  { %v1097_v22 = vpop.xlane.xlu1 %1096 }
 0xcb6   :  { %v1098_v27 = vsub.f32 %v1094_v58, %v1097_v22 }
 0xcb8   :  { %v1099_v28 = vmul.f32 1.442695, %v1098_v27 }
 0xcba   :  { %2049 = vpow2.f32 %v1099_v28 }
 0xcc0   :  { %v2050_v31 = vpop.eup %2049 }
 0xcc1   :  { %v1101_v34 = vsel %vm250_vm5, %v2050_v31, 0.0 }
 0xccd   :  { %v1107_v23 = vpop.permute.xlu1 %1106 }
 0xcce   :  { %1127 = vmatpush.msra.mxu0 %v1107_v23 }
 0xcd0   :  { %1919 = vmatpush.xpose.msk.msrb.mxu0 %vm250_vm5, %v1201_v0 }
 0xcd5   :  { %v1265_v24 = vpop.permute.xlu1 %1264 }
 0xcd6   :  { %1923 = vmatmul.msk.f32.vlgmr.msra.gmra.mxu1 %vm250_vm5, %v1265_v24 }
 0xceb   :  { %v1064_v25 = vpop.f32.mrf.mxu1 }
 0xcec   :  { %v2751_v26 = vadd.f32 %v1995_v53, %v1064_v25 }
 0xcee   :  { %1410 = vrot.lane.b32.xlu1 %v2751_v26, %s2301_s26  ;;  %1412 = vrot.lane.b32.xlu0 %v2751_v26, %s2303_s27 }
 0xcef   :  { %1346 = vrot.lane.b32.xlu2 %v2751_v26, %s2302_s0 }
 0xcf3   :  { %v1157_v30 = vpop.f32.mrf.mxu1 }
 0xcf4   :  { %v1160_v33 = vsel %vm2458_vm6, %v1157_v30, -1e+30 }
 0xcf5   :  { %v1161_v36 = vsel %vm250_vm5, %v1160_v33, -inf }
 0xcf6   :  { %1476 = vrot.lane.b32.xlu1 %v2751_v26, %s2306_s14  ;;  %1544 = vrot.lane.b32.xlu0 %v2751_v26, %s2305_s13 }
 0xcf7   :  { %1478 = vrot.lane.b32.xlu2 %v2751_v26, %s2307_s15 }
 0xd20   :  { %1102 = vadd.xlane.f32.xlu2 %v1101_v34  ;;  %1162 = vmax.xlane.f32.xlu0 %v1161_v36 }
 0xd38   :  { %1542 = vrot.lane.b32.xlu2 %v2751_v26, %s2309_s3 }
 0xd49   :  { %v1347_v46 = vpop.permute.xlu2 %1346 }
 0xd51   :  { %v1479_v48 = vpop.permute.xlu2 %1478 }
 0xd53   :  { %v1289_v39 = vpop.f32.mrf.mxu1 }
 0xd54   :  { %v1292_v40 = vsel %vm2458_vm6, %v1289_v39, -1e+30 }
 0xd55   :  { %v1293_v42 = vsel %vm250_vm5, %v1292_v40, -inf }
 0xd60   :  { %v1413_v41 = vpop.permute.xlu0 %1412  ;;  %v1411_v43 = vpop.permute.xlu1 %1410 }
 0xd61   :  { %1294 = vmax.xlane.f32.xlu2 %v1293_v42  ;;  %1928 = vmatpush.xpose.msk.msrb.mxu1 %vm250_vm5, %v1413_v41 }
 0xd64   :  { %1929 = vmatmul.msk.f32.vlgmr.msrb.gmra.mxu1 %vm250_vm5, %v1411_v43 }
 0xd68   :  { %v1545_v45 = vpop.permute.xlu0 %1544  ;;  %v1477_v50 = vpop.permute.xlu1 %1476 }
 0xd69   :  { %1934 = vmatpush.xpose.msk.msra.mxu1 %vm250_vm5, %v1545_v45 }
 0xd93   :  { %v1103_v32 = vpop.xlane.xlu2 %1102  ;;  %v1163_v51 = vpop.xlane.xlu0 %1162 }
 0xd94   :  { %2051 = vrcp.f32 %v1103_v32  ;;  %v1164_v52 = vsub.f32 %v1160_v33, %v1163_v51 }
 0xd96   :  { %v1165_v53 = vmul.f32 1.442695, %v1164_v52 }
 0xd98   :  { %2053 = vpow2.f32 %v1165_v53 }
 0xd9a   :  { %v2052_v35 = vpop.eup %2051 }
 0xd9b   :  { %v1105_v37 = vmul.f32 %v2052_v35, %v2050_v31  ;;  %v1543_v49 = vpop.permute.xlu2 %1542 }
 0xd9c   :  { %1935 = vmatmul.msk.f32.vlgmr.msra.gmra.mxu1 %vm250_vm5, %v1543_v49 }
 0xd9d   :  { %1915 = vmatmul.msk.f32.vlgmr.msra.gmra.mxu0 %vm250_vm5, %v1105_v37 }
 0xd9e   :  { %1925 = vmatpush.xpose.msk.msra.mxu0 %vm250_vm5, %v1347_v46  ;;  %v2054_v59 = vpop.eup %2053 }
 0xd9f   :  { %v1167_v60 = vsel %vm250_vm5, %v2054_v59, 0.0 }
 0xda5   :  { %1920 = vmatmul.msk.f32.vlgmr.msrb.gmra.mxu0 %vm250_vm5, %v1199_v38 }
 0xda6   :  { %1931 = vmatpush.xpose.msk.msrb.mxu0 %vm250_vm5, %v1479_v48 }
 0xdad   :  { %1926 = vmatmul.msk.f32.vlgmr.msra.gmra.mxu0 %vm250_vm5, %v2751_v26 }
 0xdb5   :  { %1932 = vmatmul.msk.f32.vlgmr.msrb.gmra.mxu0 %vm250_vm5, %v1477_v50 }
 0xdd4   :  { %v1295_v62 = vpop.xlane.xlu2 %1294 }
 0xdd5   :  { %v1296_v0 = vsub.f32 %v1292_v40, %v1295_v62 }
 0xdd7   :  { %v1297_v1 = vmul.f32 1.442695, %v1296_v0 }
 0xdd9   :  { %2055 = vpow2.f32 %v1297_v1 }
 0xddf   :  { %v2798_v2 = vpop.eup %2055 }
 0xde0   :  { %v1299_v7 = vsel %vm250_vm5, %v2798_v2, 0.0 }
 0xde1   :  { %v1435_v54 = vpop.f32.mrf.mxu1 }
 0xde2   :  { %v1438_v56 = vsel %vm2458_vm6, %v1435_v54, -1e+30 }
 0xde3   :  { %v1439_v47 = vsel %vm250_vm5, %v1438_v56, -inf }
 0xde4   :  { %1440 = vmax.xlane.f32.xlu2 %v1439_v47 }
 0xdec   :  { %1168 = vadd.xlane.f32.xlu2 %v1167_v60 }
 0xe04   :  { %1172 = vrot.lane.b32.xlu2 %v2711_v55, %s2304_s28 }
 0xe0c   :  { %1384 = vrot.lane.b32.xlu2 %v2751_v26, %s2308_s16 }
 0xe19   :  { %v1567_v3 = vpop.f32.mrf.mxu1 }
 0xe1a   :  { %v1570_v4 = vsel %vm2458_vm6, %v1567_v3, -1e+30  ;;  %v2795_v5 = vpop.f32.mrf.mxu0 }
 0xe1b   :  { %v1571_v29 = vsel %vm250_vm5, %v1570_v4, -inf }
 0xe1c   :  { %1572 = vmax.xlane.f32.xlu0 %v1571_v29 }
 0xe22   :  { %v1223_v63 = vpop.f32.mrf.mxu0 }
 0xe23   :  { %v1226_v58 = vsel %vm2458_vm6, %v1223_v63, -1e+30 }
 0xe24   :  { %1300 = vadd.xlane.f32.xlu0 %v1299_v7  ;;  %v1227_v8 = vsel %vm250_vm5, %v1226_v58, -inf }
 0xe25   :  { %1228 = vmax.xlane.f32.xlu1 %v1227_v8 }
 0xe2a   :  { %v1369_v9 = vpop.f32.mrf.mxu0 }
 0xe2b   :  { %v1372_v11 = vsel %vm2458_vm6, %v1369_v9, -1e+30 }
 0xe2c   :  { %v1373_v12 = vsel %vm250_vm5, %v1372_v11, -inf }
 0xe2d   :  { %1374 = vmax.xlane.f32.xlu0 %v1373_v12 }
 0xe32   :  { %v1501_v31 = vpop.f32.mrf.mxu0 }
 0xe33   :  { %v1504_v36 = vsel %vm2458_vm6, %v1501_v31, -1e+30 }
 0xe34   :  { %v1505_v38 = vsel %vm250_vm5, %v1504_v36, -inf }
 0xe41   :  { %1238 = vrot.lane.b32.xlu0 %v2711_v55, %s2311_s17 }
 0xe57   :  { %v1441_v61 = vpop.xlane.xlu2 %1440 }
 0xe58   :  { %v1442_v13 = vsub.f32 %v1438_v56, %v1441_v61 }
 0xe5a   :  { %v1443_v14 = vmul.f32 1.442695, %v1442_v13  ;;  %v1940_v13 = vld [vmem:[%s2955_s4 + $0x38] sm:$0xff] }
 0xe5b   :  { %1646 = vmatpush.msra.mxu0 %v1940_v13  ;;  %v1954_v13 = vld [vmem:[%s2959_s8 + $0x58] sm:$0xff] }
 0xe5c   :  { %2057 = vpow2.f32 %v1443_v14  ;;  %v1939_v14 = vld [vmem:[%s2955_s4 + $0x30] sm:$0xff] }
 0xe5d   :  { %1647 = vmatpush.msra.mxu0 %v1939_v14 }
 0xe5f   :  { %v1169_v15 = vpop.xlane.xlu2 %1168 }
 0xe60   :  { %2059 = vrcp.f32 %v1169_v15  ;;  %v1938_v15 = vld [vmem:[%s2955_s4 + $0x28] sm:$0xff] }
 0xe61   :  { %1648 = vmatpush.msra.mxu0 %v1938_v15 }
 0xe62   :  { %v2810_v16 = vpop.eup %2057 }
 0xe63   :  { %v1445_v17 = vsel %vm250_vm5, %v2810_v16, 0.0 }
 0xe64   :  { %1446 = vadd.xlane.f32.xlu1 %v1445_v17  ;;  %v1937_v17 = vld [vmem:[%s2955_s4 + $0x20] sm:$0xff] }
 0xe65   :  { %1649 = vmatpush.msra.mxu0 %v1937_v17 }
 0xe66   :  { %v2060_v18 = vpop.eup %2059 }
 0xe67   :  { %v1171_v19 = vmul.f32 %v2060_v18, %v2054_v59  ;;  %v1173_v20 = vpop.permute.xlu2 %1172 }
 0xe68   :  { %1193 = vmatpush.msrb.mxu3 %v1173_v20 }
 0xe69   :  { %1918 = vmatmul.msk.f32.vlgmr.msrb.gmra.mxu3 %vm250_vm5, %v1171_v19 }
 0xe6f   :  { %v1385_v45 = vpop.permute.xlu2 %1384 }
 0xe7d   :  { %1304 = vrot.lane.b32.xlu1 %v2711_v55, %s2310_s1 }
 0xe8f   :  { %v1573_v21 = vpop.xlane.xlu0 %1572 }
 0xe90   :  { %v1574_v22 = vsub.f32 %v1570_v4, %v1573_v21 }
 0xe92   :  { %v1575_v23 = vmul.f32 1.442695, %v1574_v22 }
 0xe94   :  { %2061 = vpow2.f32 %v1575_v23 }
 0xe97   :  { %v1301_v24 = vpop.xlane.xlu0 %1300 }
 0xe98   :  { %v1229_v27 = vpop.xlane.xlu1 %1228 }
 0xe99   :  { %v1230_v30 = vsub.f32 %v1226_v58, %v1229_v27 }
 0xe9a   :  { %v2817_v25 = vpop.eup %2061 }
 0xe9b   :  { %v1577_v28 = vsel %vm250_vm5, %v2817_v25, 0.0  ;;  %v1231_v33 = vmul.f32 1.442695, %v1230_v30 }
 0xe9c   :  { %1578 = vadd.xlane.f32.xlu2 %v1577_v28 }
 0xe9d   :  { %2063 = vpow2.f32 %v1231_v33 }
 0xea0   :  { %v1375_v34 = vpop.xlane.xlu0 %1374 }
 0xea1   :  { %v1376_v55 = vsub.f32 %v1372_v11, %v1375_v34  ;;  %v1996_v34 = vld [vmem:[#allocation8 + $0x1] ss:$0 sm:$0xff] }
 0xea3   :  { %v1377_v39 = vmul.f32 1.442695, %v1376_v55  ;;  %v2064_v40 = vpop.eup %2063 }
 0xea4   :  { %v1233_v41 = vsel %vm250_vm5, %v2064_v40, 0.0 }
 0xea5   :  { %2065 = vpow2.f32 %v1377_v39 }
 0xea6   :  { %2067 = vrcp.f32 %v1301_v24 }
 0xea7   :  { %1506 = vmax.xlane.f32.xlu1 %v1505_v38 }
 0xeab   :  { %v2066_v42 = vpop.eup %2065 }
 0xeac   :  { %v1379_v46 = vsel %vm250_vm5, %v2066_v42, 0.0  ;;  %v2068_v48 = vpop.eup %2067 }
 0xead   :  { %v1303_v32 = vmul.f32 %v2068_v48, %v2798_v2 }
 0xeaf   :  { %1234 = vadd.xlane.f32.xlu1 %v1233_v41 }
 0xeb3   :  { %v1239_v43 = vpop.permute.xlu0 %1238 }
 0xeb4   :  { %1259 = vmatpush.msra.mxu2 %v1239_v43 }
 0xeb6   :  { %1405 = vmatpush.msrb.mxu2 %v1385_v45 }
 0xeb7   :  { %1380 = vadd.xlane.f32.xlu1 %v1379_v46 }
 0xed0   :  { %1450 = vrot.lane.b32.xlu1 %v2751_v26, %s2304_s28 }
 0xed7   :  { %v1447_v44 = vpop.xlane.xlu1 %1446 }
 0xed8   :  { %1516 = vrot.lane.b32.xlu1 %v2751_v26, %s2311_s17 }
 0xee0   :  { %1582 = vrot.lane.b32.xlu1 %v2751_v26, %s2310_s1 }
 0xeec   :  { %v1195_v60 = vpop.f32.mrf.mxu3 }
 0xeef   :  { %v1305_v35 = vpop.permute.xlu1 %1304 }
 0xef0   :  { %1325 = vmatpush.msra.mxu3 %v1305_v35 }
 0xef1   :  { %1924 = vmatmul.msk.f32.vlgmr.msra.gmra.mxu3 %vm250_vm5, %v1303_v32 }
 0xf0f   :  { %v1579_v3 = vpop.xlane.xlu2 %1578 }
 0xf1a   :  { %v1507_v37 = vpop.xlane.xlu1 %1506 }
 0xf1b   :  { %v1508_v49 = vsub.f32 %v1504_v36, %v1507_v37 }
 0xf1d   :  { %v1509_v50 = vmul.f32 1.442695, %v1508_v49  ;;  %v1948_v49 = vld [vmem:[%s2957_s6 + $0x38] sm:$0xff] }
 0xf1f   :  { %2069 = vpow2.f32 %v1509_v50  ;;  %v1947_v50 = vld [vmem:[%s2957_s6 + $0x30] sm:$0xff] }
 0xf22   :  { %v1235_v51 = vpop.xlane.xlu1 %1234 }
 0xf23   :  { %2071 = vrcp.f32 %v1235_v51  ;;  %v1946_v51 = vld [vmem:[%s2957_s6 + $0x28] sm:$0xff] }
 0xf25   :  { %v2070_v52 = vpop.eup %2069 }
 0xf26   :  { %v1511_v53 = vsel %vm250_vm5, %v2070_v52, 0.0 }
 0xf27   :  { %1512 = vadd.xlane.f32.xlu0 %v1511_v53 }
 0xf29   :  { %v2072_v26 = vpop.eup %2071 }
 0xf2a   :  { %v1237_v54 = vmul.f32 %v2072_v26, %v2064_v40  ;;  %v1381_v56 = vpop.xlane.xlu1 %1380 }
 0xf2b   :  { %2073 = vrcp.f32 %v1381_v56 }
 0xf2c   :  { %1921 = vmatmul.msk.f32.vlgmr.msra.gmra.mxu2 %vm250_vm5, %v1237_v54  ;;  %2075 = vrcp.f32 %v1447_v44 }
 0xf2d   :  { %2077 = vrcp.f32 %v1579_v3 }
 0xf31   :  { %v2074_v47 = vpop.eup %2073 }
 0xf32   :  { %v1383_v59 = vmul.f32 %v2074_v47, %v2066_v42  ;;  %v2076_v62 = vpop.eup %2075 }
 0xf33   :  { %v1449_v0 = vmul.f32 %v2076_v62, %v2810_v16  ;;  %v2078_v29 = vpop.eup %2077 }
 0xf34   :  { %1927 = vmatmul.msk.f32.vlgmr.msrb.gmra.mxu2 %vm250_vm5, %v1383_v59  ;;  %v1581_v2 = vmul.f32 %v2078_v29, %v2817_v25  ;;  %v1998_v29 = vld [vmem:[%s2961_s10 + $0x7] ss:$0 sm:$0xff] }
 0xf3b   :  { %1331 = vrot.lane.b32.xlu0 %v1195_v60, %s2293_s30 }
 0xf42   :  { %v1451_v1 = vpop.permute.xlu1 %1450 }
 0xf43   :  { %1471 = vmatpush.msrb.mxu3 %v1451_v1  ;;  %v1997_v1 = vld [vmem:[%s2961_s10 + $0x6] ss:$0 sm:$0xff] }
 0xf44   :  { %1930 = vmatmul.msk.f32.vlgmr.msrb.gmra.mxu3 %vm250_vm5, %v1449_v0 }
 0xf4a   :  { %v1517_v4 = vpop.permute.xlu1 %1516 }
 0xf4b   :  { %1537 = vmatpush.msra.mxu2 %v1517_v4 }
 0xf4d   :  { %1740 = vmatpush.msrb.mxu2 %v1948_v49 }
 0xf4f   :  { %1741 = vmatpush.msrb.mxu2 %v1947_v50 }
 0xf51   :  { %1742 = vmatpush.msrb.mxu2 %v1946_v51 }
 0xf52   :  { %v1583_v63 = vpop.permute.xlu1 %1582 }
 0xf53   :  { %1603 = vmatpush.msra.mxu3 %v1583_v63 }
 0xf54   :  { %1936 = vmatmul.msk.f32.vlgmr.msra.gmra.mxu3 %vm250_vm5, %v1581_v2 }
 0xf74   :  { %v1327_v58 = vpop.f32.mrf.mxu3 }
 0xf75   :  { %1339 = vrot.lane.b32.xlu2 %v1327_v58, %s2313_s11  ;;  %v1958_v58 = vld [vmem:[%s2959_s8 + $0x78] sm:$0xff] }
 0xf76   :  { %1776 = vmatpush.msrb.mxu1 %v1958_v58 }
 0xf9a   :  { %v1513_v7 = vpop.xlane.xlu0 %1512 }
 0xf9b   :  { %2079 = vrcp.f32 %v1513_v7  ;;  %v1957_v7 = vld [vmem:[%s2959_s8 + $0x70] sm:$0xff] }
 0xf9c   :  { %1777 = vmatpush.msrb.mxu1 %v1957_v7 }
 0xfa1   :  { %v2080_v8 = vpop.eup %2079 }
 0xfa2   :  { %v1515_v9 = vmul.f32 %v2080_v8, %v2070_v52  ;;  %v1945_v52 = vld [vmem:[%s2957_s6 + $0x20] sm:$0xff]  ;;  %v1956_v8 = vld [vmem:[%s2959_s8 + $0x68] sm:$0xff] }
 0xfa3   :  { %1743 = vmatpush.msrb.mxu2 %v1945_v52  ;;  %1778 = vmatpush.msrb.mxu1 %v1956_v8 }
 0xfa4   :  { %1933 = vmatmul.msk.f32.vlgmr.msra.gmra.mxu2 %vm250_vm5, %v1515_v9 }
 0xfad   :  { %v1332_v21 = vpop.permute.xlu0 %1331 }
 0xfae   :  { %v1342_v22 = vsel %vm250_vm5, %v2795_v5, %v1332_v21 }
 0xfaf   :  { %v1261_v12 = vpop.f32.mrf.mxu2 }
 0xfb7   :  { %v1407_v16 = vpop.f32.mrf.mxu2 }
 0xfc7   :  { %v1473_v11 = vpop.f32.mrf.mxu3 }
 0xfc8   :  { %1609 = vrot.lane.b32.xlu1 %v1473_v11, %s2293_s30 }
 0xfcf   :  { %v1340_v24 = vpop.permute.xlu2 %1339 }
 0xfd0   :  { %1335 = vrot.lane.b32.xlu1 %v1261_v12, %s2312_s7  ;;  %v1955_v12 = vld [vmem:[%s2959_s8 + $0x60] sm:$0xff] }
 0xfd1   :  { %1779 = vmatpush.msrb.mxu1 %v1955_v12 }
 0xfd3   :  { %1780 = vmatpush.msrb.mxu1 %v1954_v13 }
 0xfd7   :  { %v1605_v61 = vpop.f32.mrf.mxu3 }
 0xfd8   :  { %1617 = vrot.lane.b32.xlu0 %v1605_v61, %s2313_s11 }
0x1027   :  { %v1539_v18 = vpop.f32.mrf.mxu2 }
0x1028   :  { %1613 = vrot.lane.b32.xlu1 %v1539_v18, %s2312_s7  ;;  %s1857_s7 = sshll.u32 %s2963_s12, 4  ;;  %s1858_s7 = int_to_ptr.hbm [resolvable:$true] %s1857_s7 }
0x103a   :  { %v1610_v19 = vpop.permute.xlu1 %1609 }
0x103b   :  { %v1620_v20 = vsel %vm250_vm5, %v1407_v16, %v1610_v19 }
0x1042   :  { %v1336_v23 = vpop.permute.xlu1 %1335 }
0x1043   :  { %v1343_v25 = vsel %vm524_vm10, %v1342_v22, %v1336_v23 }
0x1044   :  { %v1344_v27 = vsel %vm526_vm11, %v1343_v25, %v1340_v24  ;;  %v1953_v24 = vld [vmem:[%s2959_s8 + $0x50] sm:$0xff]  ;;  %v1952_v25 = vld [vmem:[%s2959_s8 + $0x48] sm:$0xff] }
0x1045   :  { %1941 = vmatmul.msk.f32.vlgmr.msra.gmra.mxu0 %vm154_vm0, %v1344_v27  ;;  %1781 = vmatpush.msrb.mxu1 %v1953_v24  ;;  %v1951_v27 = vld [vmem:[%s2959_s8 + $0x40] sm:$0xff]  ;;  %s2314_s8 = smov [#allocation14]  }
0x1046   :  { %s1855_s3 = sshll.u32 %s2314_s8, 4  ;;  %s1856_s3 = int_to_ptr.vmem [resolvable:$true] %s1855_s3 }
0x1047   :  { %1782 = vmatpush.msrb.mxu1 %v1952_v25 }
0x1049   :  { %1783 = vmatpush.msrb.mxu1 %v1951_v27 }
0x104a   :  { %v1618_v30 = vpop.permute.xlu0 %1617 }
0x109a   :  { %v1614_v28 = vpop.permute.xlu1 %1613 }
0x109b   :  { %v1621_v31 = vsel %vm524_vm10, %v1620_v20, %v1614_v28  ;;  %v1999_v28 = vld [vmem:[#allocation10 + $0x1] ss:$0 sm:$0xff] }
0x109c   :  { %v1622_v33 = vsel %vm526_vm11, %v1621_v31, %v1618_v30 }
0x109d   :  { %1942 = vmatmul.msk.f32.gmra.mxu0 %vm154_vm0, %v1622_v33 }
0x10c2   :  { %v1651_v36 = vpop.f32.mrf.mxu0 }
0x10c3   :  { %v1657_v5 = vadd.f32 %v1651_v36, %v2675_v6 }
0x10c5   :  { %v2870_v55 = vadd.f32 %v1996_v34, %v1657_v5 }
0x10c7   :  { %v1665_v38 = vsel %vm154_vm0, %v2870_v55, 0.0 }
0x10c8   :  { %1666 = vadd.xlane.f32.xlu1 %v1665_v38  ;;  %v2000_v38 = vld [vmem:[#allocation11 + $0x1] ss:$0 sm:$0xff] }
0x111a   :  { %v1654_v39 = vpop.f32.mrf.mxu0 }
0x111b   :  { %v1658_v40 = vadd.f32 %v1654_v39, %v2725_v57 }
0x111d   :  { %v2875_v41 = vadd.f32 %v1996_v34, %v1658_v40 }
0x111f   :  { %v1668_v42 = vsel %vm154_vm0, %v2875_v41, 0.0 }
0x1120   :  { %1669 = vadd.xlane.f32.xlu0 %v1668_v42 }
0x113b   :  { %v1667_v43 = vpop.xlane.xlu1 %1666 }
0x113c   :  { %v1671_v45 = vmul.f32 %v1667_v43, %v2411_v10 }
0x113e   :  { %v1673_v6 = vsub.f32 %v2870_v55, %v1671_v45 }
0x1140   :  { %v1675_v46 = vmul.f32 %v1673_v6, %v1673_v6 }
0x1142   :  { %v1677_v44 = vsel %vm154_vm0, %v1675_v46, 0.0 }
0x1143   :  { %1678 = vadd.xlane.f32.xlu2 %v1677_v44 }
0x1193   :  { %v1670_v48 = vpop.xlane.xlu0 %1669 }
0x1194   :  { %v1672_v32 = vmul.f32 %v1670_v48, %v2411_v10 }
0x1196   :  { %v1674_v57 = vsub.f32 %v2875_v41, %v1672_v32 }
0x1198   :  { %v1676_v35 = vmul.f32 %v1674_v57, %v1674_v57 }
0x119a   :  { %v1680_v37 = vsel %vm154_vm0, %v1676_v35, 0.0 }
0x119b   :  { %1681 = vadd.xlane.f32.xlu1 %v1680_v37 }
0x11b6   :  { %v1679_v53 = vpop.xlane.xlu2 %1678 }
0x11b7   :  { %v1683_v26 = vmul.f32 %v1679_v53, %v2411_v10 }
0x11b9   :  { %v1685_v54 = vadd.f32 1e-05, %v1683_v26 }
0x11bb   :  { %2081 = vrsqrt.f32 %v1685_v54  ;;  %vm1693_vm6 = vweird.f32 %v1685_v54 }
0x11c1   :  { %v2082_v56 = vpop.eup %2081 }
0x11c2   :  { %v1688_v47 = vmul.f32 %v2082_v56, %v1685_v54  ;;  %vm1694_vm5 = vweird.f32 %v2082_v56 }
0x11c3   :  { %vm1695_vm10 = vmor %vm1693_vm6, %vm1694_vm5 }
0x11c4   :  { %v1689_v59 = vmul.f32 %v2082_v56, %v1688_v47 }
0x11c6   :  { %v1690_v60 = vmul.f32 0.5, %v1689_v59 }
0x11c8   :  { %v1691_v62 = vsub.f32 1.5, %v1690_v60 }
0x11ca   :  { %v1692_v0 = vmul.f32 %v2082_v56, %v1691_v62 }
0x11cc   :  { %v1696_v3 = vsel %vm1695_vm10, %v2082_v56, %v1692_v0  ;;  %v2001_v0 = vld [vmem:[#allocation13] ss:$0 sm:$0xff] }
0x11cd   :  { %v1707_v4 = vmul.f32 %v1696_v3, %v1673_v6 }
0x11cf   :  { %v1710_v2 = vmul.f32 %v1997_v1, %v1707_v4  ;;  %v2002_v4 = vld [vmem:[#allocation13 + $0x1] ss:$0 sm:$0xff] }
0x11d1   :  { %v1713_v63 = vadd.f32 %v1998_v29, %v1710_v2 }
0x11d3   :  { %1949 = vmatmul.msk.f32.vlgmr.msrb.gmra.mxu2 %vm154_vm0, %v1713_v63 }
0x120e   :  { %v1682_v9 = vpop.xlane.xlu1 %1681 }
0x120f   :  { %v1684_v11 = vmul.f32 %v1682_v9, %v2411_v10 }
0x1211   :  { %v1686_v61 = vadd.f32 1e-05, %v1684_v11 }
0x1213   :  { %2083 = vrsqrt.f32 %v1686_v61  ;;  %vm1703_vm14 = vweird.f32 %v1686_v61 }
0x1219   :  { %v2084_v14 = vpop.eup %2083 }
0x121a   :  { %v1698_v15 = vmul.f32 %v2084_v14, %v1686_v61  ;;  %vm1704_vm11 = vweird.f32 %v2084_v14 }
0x121b   :  { %vm1705_vm1 = vmor %vm1703_vm14, %vm1704_vm11 }
0x121c   :  { %v1699_v16 = vmul.f32 %v2084_v14, %v1698_v15 }
0x121e   :  { %v1700_v17 = vmul.f32 0.5, %v1699_v16 }
0x1220   :  { %v1701_v18 = vsub.f32 1.5, %v1700_v17 }
0x1222   :  { %v1702_v19 = vmul.f32 %v2084_v14, %v1701_v18 }
0x1224   :  { %v1706_v20 = vsel %vm1705_vm1, %v2084_v14, %v1702_v19 }
0x1225   :  { %v1708_v21 = vmul.f32 %v1706_v20, %v1674_v57 }
0x1227   :  { %v1711_v22 = vmul.f32 %v1997_v1, %v1708_v21 }
0x1229   :  { %v1714_v23 = vadd.f32 %v1998_v29, %v1711_v22 }
0x122b   :  { %1950 = vmatmul.msk.f32.gmra.mxu2 %vm154_vm0, %v1714_v23 }
0x1256   :  { %v1745_v30 = vpop.f32.mrf.mxu2 }
0x1257   :  { %v1746_v31 = vadd.f32 %v1999_v28, %v1745_v30 }
0x1259   :  { %v1751_v33 = vmax.f32 %v1746_v31, 0.0 }
0x125b   :  { %1959 = vmatmul.msk.f32.vlgmr.msrb.gmra.mxu1 %vm942_vm15, %v1751_v33 }
0x12ae   :  { %v1748_v34 = vpop.f32.mrf.mxu2 }
0x12af   :  { %v1749_v36 = vadd.f32 %v1999_v28, %v1748_v34 }
0x12b1   :  { %v1752_v5 = vmax.f32 %v1749_v36, 0.0 }
0x12b3   :  { %1960 = vmatmul.msk.f32.gmra.mxu1 %vm942_vm15, %v1752_v5 }
0x12d8   :  { %v1785_v39 = vpop.f32.mrf.mxu1 }
0x12d9   :  { %v1791_v40 = vadd.f32 %v1785_v39, %v2870_v55 }
0x12db   :  { %v1795_v42 = vadd.f32 %v2000_v38, %v1791_v40 }
0x12dd   :  { %v1799_v43 = vsel %vm154_vm0, %v1795_v42, 0.0 }
0x12de   :  { %1800 = vadd.xlane.f32.xlu0 %v1799_v43 }
0x1330   :  { %v1788_v45 = vpop.f32.mrf.mxu1 }
0x1331   :  { %v1792_v6 = vadd.f32 %v1788_v45, %v2875_v41 }
0x1333   :  { %v1796_v46 = vadd.f32 %v2000_v38, %v1792_v6 }
0x1335   :  { %v1802_v44 = vsel %vm154_vm0, %v1796_v46, 0.0 }
0x1336   :  { %1803 = vadd.xlane.f32.xlu2 %v1802_v44 }
0x1351   :  { %v1801_v48 = vpop.xlane.xlu0 %1800 }
0x1352   :  { %v1805_v32 = vmul.f32 %v1801_v48, %v2411_v10 }
0x1354   :  { %v1807_v57 = vsub.f32 %v1795_v42, %v1805_v32 }
0x1356   :  { %v1809_v35 = vmul.f32 %v1807_v57, %v1807_v57 }
0x1358   :  { %v1811_v37 = vsel %vm154_vm0, %v1809_v35, 0.0 }
0x1359   :  { %1812 = vadd.xlane.f32.xlu1 %v1811_v37 }
0x13a9   :  { %v1804_v55 = vpop.xlane.xlu2 %1803 }
0x13aa   :  { %v1806_v49 = vmul.f32 %v1804_v55, %v2411_v10 }
0x13ac   :  { %v1808_v50 = vsub.f32 %v1796_v46, %v1806_v49 }
0x13ae   :  { %v1810_v51 = vmul.f32 %v1808_v50, %v1808_v50 }
0x13b0   :  { %v1814_v52 = vsel %vm154_vm0, %v1810_v51, 0.0 }
0x13b1   :  { %1815 = vadd.xlane.f32.xlu0 %v1814_v52 }
0x13cc   :  { %v1813_v41 = vpop.xlane.xlu1 %1812 }
0x13cd   :  { %v1817_v53 = vmul.f32 %v1813_v41, %v2411_v10 }
0x13cf   :  { %v1819_v26 = vadd.f32 1e-05, %v1817_v53 }
0x13d1   :  { %2085 = vrsqrt.f32 %v1819_v26  ;;  %vm1827_vm2 = vweird.f32 %v1819_v26 }
0x13d7   :  { %v2086_v54 = vpop.eup %2085 }
0x13d8   :  { %v1822_v56 = vmul.f32 %v2086_v54, %v1819_v26  ;;  %vm1828_vm15 = vweird.f32 %v2086_v54 }
0x13d9   :  { %vm1829_vm3 = vmor %vm1827_vm2, %vm1828_vm15 }
0x13da   :  { %v1823_v47 = vmul.f32 %v2086_v54, %v1822_v56 }
0x13dc   :  { %v1824_v59 = vmul.f32 0.5, %v1823_v47 }
0x13de   :  { %v1825_v60 = vsub.f32 1.5, %v1824_v59 }
0x13e0   :  { %v1826_v62 = vmul.f32 %v2086_v54, %v1825_v60 }
0x13e2   :  { %v1830_v1 = vsel %vm1829_vm3, %v2086_v54, %v1826_v62 }
0x13e3   :  { %v1841_v3 = vmul.f32 %v1830_v1, %v1807_v57 }
0x13e5   :  { %v1844_v29 = vmul.f32 %v2001_v0, %v1841_v3 }
0x13e7   :  { %v1847_v2 = vadd.f32 %v2002_v4, %v1844_v29 }
0x13e9   :  { %1849 = vst.msk [vmem:[#allocation14] sm:$0xff] %vm154_vm0, %v1847_v2 }
0x1424   :  { %v1816_v63 = vpop.xlane.xlu0 %1815 }
0x1425   :  { %v1818_v58 = vmul.f32 %v1816_v63, %v2411_v10 }
0x1427   :  { %v1820_v7 = vadd.f32 1e-05, %v1818_v58 }
0x1429   :  { %2087 = vrsqrt.f32 %v1820_v7  ;;  %vm1837_vm7 = vweird.f32 %v1820_v7 }
0x142f   :  { %v2088_v8 = vpop.eup %2087 }
0x1430   :  { %v1832_v9 = vmul.f32 %v2088_v8, %v1820_v7  ;;  %vm1838_vm4 = vweird.f32 %v2088_v8 }
0x1431   :  { %vm1839_vm8 = vmor %vm1837_vm7, %vm1838_vm4 }
0x1432   :  { %v1833_v11 = vmul.f32 %v2088_v8, %v1832_v9 }
0x1434   :  { %v1834_v12 = vmul.f32 0.5, %v1833_v11 }
0x1436   :  { %v1835_v61 = vsub.f32 1.5, %v1834_v12 }
0x1438   :  { %v1836_v13 = vmul.f32 %v2088_v8, %v1835_v61 }
0x143a   :  { %v1840_v14 = vsel %vm1839_vm8, %v2088_v8, %v1836_v13 }
0x143b   :  { %v1842_v15 = vmul.f32 %v1840_v14, %v1808_v50 }
0x143d   :  { %v1845_v10 = vmul.f32 %v2001_v0, %v1842_v15 }
0x143f   :  { %v1848_v16 = vadd.f32 %v2002_v4, %v1845_v10 }
0x1441   :  { %1850 = vst.msk [vmem:[#allocation14 + $0x8] sm:$0xff] %vm154_vm0, %v1848_v16 }
0x1442   :  { %1863 = dma.vmem_to_hbm [thread:$0]  %s1856_s3, 256, %s1858_s7, [#allocation4], %s2292_s29, %s2292_s29, %s2293_s30  }
0x1443   :  { %2289 = dma.done.wait [#allocation4], 256  }
0x1444   :  { %2290 = vsyncadd [#allocation4], 4294967040 }
0x1445   :  { %1868 = vsyncpa [#allocation3], 1 }
0x1446   :  { %1869 = vsyncpa [#allocation6], 1 }
0x1447   :  { %1870 = vsyncpa [#allocation9], 1 }
0x1448   :  { %1871 = vsyncpa [#allocation12], 1 }
0x1449   :  { %1872 = vsyncpa [#allocation4], 1 }

</bundles_post_ra>
